<compile_context>
chip_gen: v7x
topology: tpu7x:2x2x1
jax: 0.10.0
libtpu: 0.0.40
codegen_flags: <defaults>
</compile_context>

<pallas_src>
import functools

import jax
import jax.numpy as jnp
from jax import lax
from jax.experimental import pallas as pl
from jax.experimental.pallas import tpu as pltpu

LANE = 128              # TPU lane width
TARGET_TILE_PIX = 512   # ~output pixels (rows of the matmul) per grid step


# ----------------------------- Pallas kernels --------------------------------

def _conv_core(x_ref, w_ref, *, kh, kw, t_oh, ow):
    """Direct conv for one row-band tile: accumulate KH*KW shifted matmuls (f32 acc).

    x_ref: (1, band_h, Wp, C) bf16 NHWC band, w_ref: (KH*KW, C, OCp) bf16.
    Returns acc of shape (t_oh*ow, OCp) f32.
    """
    cin = x_ref.shape[-1]
    ocp = w_ref.shape[-1]
    m_tile = t_oh * ow
    band = x_ref[0]                                   # (band_h, Wp, C)
    acc = jnp.zeros((m_tile, ocp), jnp.float32)
    for i in range(kh):
        for j in range(kw):
            win = band[i:i + t_oh, j:j + ow, :]       # (t_oh, ow, C), unit stride
            acc = acc + jnp.dot(win.reshape(m_tile, cin), w_ref[i * kw + j],
                                preferred_element_type=jnp.float32)
    return acc


def _conv_stats_kernel(x_ref, w_ref, y_ref, s1_ref, s2_ref, *, kh, kw, t_oh, ow):
    """Conv tile + per-tile partial BN statistics.  y stored bf16, stats from f32 acc.

    Rows of padded output tiles come from zero input rows -> contribute 0 to the stats.
    """
    acc = _conv_core(x_ref, w_ref, kh=kh, kw=kw, t_oh=t_oh, ow=ow)
    y_ref[...] = acc.reshape(y_ref.shape).astype(y_ref.dtype)
    # NOTE: on v5e the s1 reduction could be moved to the MXU (ones(1,M) @ acc) to
    # shorten the VPU epilogue; kept as plain reductions here for robustness.
    s1_ref[...] = jnp.sum(acc, axis=0, keepdims=True)[None]
    s2_ref[...] = jnp.sum(acc * acc, axis=0, keepdims=True)[None]


def _conv_bias_act_kernel(x_ref, w_ref, b_ref, o_ref, *, kh, kw, t_oh, ow, relu):
    """No-BN path: conv tile + bias (+ ReLU) fully fused, single pass, f32 out."""
    acc = _conv_core(x_ref, w_ref, kh=kh, kw=kw, t_oh=t_oh, ow=ow)
    out = acc.reshape(o_ref.shape) + b_ref[...]
    if relu:
        out = jnp.maximum(out, 0.0)
    o_ref[...] = out


def _affine_act_kernel(y_ref, a_ref, b_ref, o_ref, *, relu):
    """Fused BN affine (y * a + b) (+ ReLU); upcasts the bf16 staging tensor to f32."""
    out = y_ref[...].astype(jnp.float32) * a_ref[...] + b_ref[...]
    if relu:
        out = jnp.maximum(out, 0.0)
    o_ref[...] = out


# ------------------------------- helpers --------------------------------------

def _block_vmem_bytes(shape, dtype):
    """Rough padded VMEM footprint of a block ((sublane, lane) tiling of last 2 dims)."""
    itemsize = jnp.dtype(dtype).itemsize
    sub = 8 * max(1, 4 // itemsize)
    lead = 1
    for d in shape[:-2]:
        lead *= int(d)
    rows = -(-int(shape[-2]) // sub) * sub
    lanes = -(-int(shape[-1]) // 128) * 128
    return lead * rows * lanes * itemsize


def _im2col_nchw(x, kh, kw, stride, pad, oh, ow):
    """(N,C,H,W) -> (N, C*KH*KW, OH, OW), channel-major like PyTorch (fallback only)."""
    n, c, _, _ = x.shape
    xp = jnp.pad(x, ((0, 0), (0, 0), (pad, pad), (pad, pad)))
    cols = [xp[:, :, i:i + stride * oh:stride, j:j + stride * ow:stride]
            for i in range(kh) for j in range(kw)]
    cols = jnp.stack(cols, axis=2)                    # (N, C, KH*KW, OH, OW)
    return cols.reshape(n, c * kh * kw, oh, ow)


# ------------------------------- wrapper --------------------------------------

def conv2d_bn_relu(x, weight, bias, gamma, beta, *, stride, padding,
                   activation=True, batch_norm=True, eps=1e-5,
                   mxu_dtype=jnp.bfloat16):
    """x: (N, C, H, W) f32.  weight: (OC, C, KH, KW).  Returns (N, OC, OH, OW) f32."""
    n, cin, h, w = x.shape
    oc, _, kh, kw = weight.shape
    oh = (h + 2 * padding - kh) // stride + 1
    ow = (w + 2 * padding - kw) // stride + 1

    if stride != 1:
        # TODO(synk): the direct band path assumes unit stride; strided convs fall back
        # to an HBM im2col and become a 1x1 stride-1 conv over C*KH*KW channels.
        cols = _im2col_nchw(x.astype(mxu_dtype), kh, kw, stride, padding, oh, ow)
        return conv2d_bn_relu(cols, weight.reshape(oc, cin * kh * kw, 1, 1),
                              bias, gamma, beta, stride=1, padding=0,
                              activation=activation, batch_norm=batch_norm,
                              eps=eps, mxu_dtype=mxu_dtype)

    ocp = pl.cdiv(oc, LANE) * LANE          # lane-dense output channel count
    wp = w + 2 * padding
    m = n * oh * ow                          # true element count per channel (for BN)

    # --- tile selection over output rows -------------------------------------
    t_oh = min(oh, max(1, TARGET_TILE_PIX // max(1, ow)))
    w_bytes = 2 * _block_vmem_bytes((kh * kw, cin, ocp), mxu_dtype)

    def tile_bytes(t):
        return (2 * (_block_vmem_bytes((1, t + kh - 1, wp, cin), mxu_dtype)
                     + _block_vmem_bytes((1, t, ow, ocp), jnp.bfloat16))
                + 2 * _block_vmem_bytes((t * ow, ocp), jnp.float32) + w_bytes)

    while t_oh > 1 and tile_bytes(t_oh) > (12 << 20):   # stay safe on v7x's 64 MiB VMEM
        t_oh = max(1, t_oh // 2)
    tiles = pl.cdiv(oh, t_oh)
    if (n * tiles) % 2 == 1 and tiles < oh:              # keep both v7x TCs busy
        tiles += 1
        t_oh = pl.cdiv(oh, tiles)
        tiles = pl.cdiv(oh, t_oh)
    oh_pad = t_oh * tiles
    band_h = t_oh + kh - 1
    grid = (n * tiles,)

    # --- NHWC input row bands (only KH-1 halo rows duplicated, no KH*KW inflation) ---
    hp_needed = oh_pad + kh - 1
    xp = jnp.pad(x.astype(mxu_dtype),
                 ((0, 0), (0, 0),
                  (padding, padding + (hp_needed - (h + 2 * padding))),
                  (padding, padding)))
    xnhwc = xp.transpose(0, 2, 3, 1)                      # (N, Hp, Wp, C) bf16
    if tiles == 1:
        bands = xnhwc                                     # (N, band_h, Wp, C)
    else:
        bands = jnp.stack([xnhwc[:, i * t_oh:i * t_oh + band_h]
                           for i in range(tiles)], axis=1)
        bands = bands.reshape(n * tiles, band_h, wp, cin)

    # weights: (OC, C, KH, KW) -> (KH*KW, C, OCp), zero-padded OC for lane density
    wd = weight.astype(jnp.float32).transpose(2, 3, 1, 0).reshape(kh * kw, cin, oc)
    wd = jnp.pad(wd, ((0, 0), (0, 0), (0, ocp - oc))).astype(mxu_dtype)

    band_spec = pl.BlockSpec((1, band_h, wp, cin), lambda i: (i, 0, 0, 0))
    w_spec = pl.BlockSpec((kh * kw, cin, ocp), lambda i: (0, 0, 0))
    tile_spec = pl.BlockSpec((1, t_oh, ow, ocp), lambda i: (i, 0, 0, 0))
    stat_spec = pl.BlockSpec((1, 1, ocp), lambda i: (i, 0, 0))
    chan_spec = pl.BlockSpec((1, 1, 1, ocp), lambda i: (0, 0, 0, 0))

    vmem_limit = int(min(max(2 * tile_bytes(t_oh) + (8 << 20), 16 << 20), 32 << 20))
    cparams = pltpu.CompilerParams(dimension_semantics=("parallel",),
                                   vmem_limit_bytes=vmem_limit)

    if batch_norm:
        # Conv bias is cancelled exactly by training-mode BN -> dropped entirely.
        y, s1, s2 = pl.pallas_call(
            functools.partial(_conv_stats_kernel, kh=kh, kw=kw, t_oh=t_oh, ow=ow),
            out_shape=(jax.ShapeDtypeStruct((n * tiles, t_oh, ow, ocp), jnp.bfloat16),
                       jax.ShapeDtypeStruct((n * tiles, 1, ocp), jnp.float32),
                       jax.ShapeDtypeStruct((n * tiles, 1, ocp), jnp.float32)),
            grid_spec=pltpu.PrefetchScalarGridSpec(
                num_scalar_prefetch=0, grid=grid,
                in_specs=[band_spec, w_spec],
                out_specs=(tile_spec, stat_spec, stat_spec)),
            compiler_params=cparams,
        )(bands, wd)

        # Tiny per-tile partial-stat combine in plain JAX (biased batch mean/var,
        # PyTorch training-mode forward).  Padded rows contributed exact zeros.
        sum1 = jnp.sum(s1, axis=(0, 1))
        sum2 = jnp.sum(s2, axis=(0, 1))
        mean = sum1 / m
        # TODO(synk): E[x^2]-mean^2 is cancellation-prone when |mean| >> std; switch to
        # a shifted / Welford-style combine if BN numerics must match PyTorch tightly.
        var = jnp.maximum(sum2 / m - mean * mean, 0.0)
        inv = lax.rsqrt(var + eps)
        gp = jnp.pad(gamma.astype(jnp.float32), (0, ocp - oc))
        bp = jnp.pad(beta.astype(jnp.float32), (0, ocp - oc))
        a_vec = (gp * inv).reshape(1, 1, 1, ocp)
        b_vec = (bp - mean * gp * inv).reshape(1, 1, 1, ocp)

        out4 = pl.pallas_call(
            functools.partial(_affine_act_kernel, relu=activation),
            out_shape=jax.ShapeDtypeStruct((n * tiles, t_oh, ow, ocp), jnp.float32),
            grid_spec=pltpu.PrefetchScalarGridSpec(
                num_scalar_prefetch=0, grid=grid,
                in_specs=[tile_spec, chan_spec, chan_spec],
                out_specs=tile_spec),
            compiler_params=cparams,
        )(y, a_vec, b_vec)
    else:
        b = jnp.zeros((oc,), jnp.float32) if bias is None else bias.astype(jnp.float32)
        b_vec = jnp.pad(b, (0, ocp - oc)).reshape(1, 1, 1, ocp)
        out4 = pl.pallas_call(
            functools.partial(_conv_bias_act_kernel, kh=kh, kw=kw, t_oh=t_oh, ow=ow,
                              relu=activation),
            out_shape=jax.ShapeDtypeStruct((n * tiles, t_oh, ow, ocp), jnp.float32),
            grid_spec=pltpu.PrefetchScalarGridSpec(
                num_scalar_prefetch=0, grid=grid,
                in_specs=[band_spec, w_spec, chan_spec],
                out_specs=tile_spec),
            compiler_params=cparams,
        )(bands, wd, b_vec)

    # Back to NCHW to match the PyTorch module interface.
    out = out4.reshape(n, oh_pad, ow, ocp)[:, :oh, :, :oc].transpose(0, 3, 1, 2)
    return out


# ------------------------------ reference & demo ------------------------------

def _reference(x, weight, bias, gamma, beta, stride, padding, activation,
               batch_norm, eps=1e-5):
    y = lax.conv_general_dilated(
        x, weight, (stride, stride), ((padding, padding), (padding, padding)),
        dimension_numbers=("NCHW", "OIHW", "NCHW"))
    y = y + bias.reshape(1, -1, 1, 1)
    if batch_norm:
        mean = jnp.mean(y, axis=(0, 2, 3), keepdims=True)
        var = jnp.mean((y - mean) ** 2, axis=(0, 2, 3), keepdims=True)
        y = ((y - mean) * lax.rsqrt(var + eps) * gamma.reshape(1, -1, 1, 1)
             + beta.reshape(1, -1, 1, 1))
    if activation:
        y = jnp.maximum(y, 0.0)
    return y


if __name__ == "__main__":
    key = jax.random.PRNGKey(0)
    k_x, k_w, k_b, k_g, k_be = jax.random.split(key, 5)

    # module config: Conv2d(in_channels=4, out_channels=8, k=3, s=1, p=1)
    N, C, H, W = 2, 4, 16, 16
    OC, K, S, P = 8, 3, 1, 1

    x = jax.random.normal(k_x, (N, C, H, W), jnp.float32)
    weight = jax.random.normal(k_w, (OC, C, K, K), jnp.float32) * 0.1
    bias = jax.random.normal(k_b, (OC,), jnp.float32) * 0.1
    gamma = 1.0 + 0.1 * jax.random.normal(k_g, (OC,), jnp.float32)   # BN weight
    beta = 0.1 * jax.random.normal(k_be, (OC,), jnp.float32)         # BN bias

    # BN + ReLU path (the default module configuration)
    fn = jax.jit(functools.partial(conv2d_bn_relu, stride=S, padding=P,
                                   activation=True, batch_norm=True))
    out = fn(x, weight, bias, gamma, beta)
    jax.block_until_ready(out)
    assert out.shape == (N, OC, H, W), out.shape
    # loose tolerance: MXU inputs & y staging are bf16, reference is pure f32
    ref = _reference(x, weight, bias, gamma, beta, S, P, True, True)
    err = float(jnp.max(jnp.abs(out - ref)))
    assert err < 1e-1, f"BN path max abs error too large: {err}"

    # no-BN path (bias + ReLU fused into the conv kernel)
    fn2 = jax.jit(functools.partial(conv2d_bn_relu, stride=S, padding=P,
                                    activation=True, batch_norm=False))
    out2 = fn2(x, weight, bias, gamma, beta)
    jax.block_until_ready(out2)
    ref2 = _reference(x, weight, bias, gamma, beta, S, P, True, False)
    err2 = float(jnp.max(jnp.abs(out2 - ref2)))
    assert err2 < 1e-1, f"no-BN path max abs error too large: {err2}"

    print("KERNEL_OK")
</pallas_src>

<mosaic_0001>
module attributes {stable_mosaic.version = 11 : i64} {
  func.func @_conv_stats_kernel(%arg0: i32, %arg1: memref<1x18x18x4xbf16, #tpu.memory_space<vmem>>, %arg2: memref<9x4x128xbf16, #tpu.memory_space<vmem>>, %arg3: memref<1x16x16x128xbf16, #tpu.memory_space<vmem>>, %arg4: memref<1x1x128xf32, #tpu.memory_space<vmem>>, %arg5: memref<1x1x128xf32, #tpu.memory_space<vmem>>) attributes {dimension_semantics = [#tpu.dimension_semantics<parallel>], iteration_bounds = array<i64: 2>, scalar_prefetch = 0 : i64, scratch_operands = 0 : i64, tpu.core_type = #tpu.core_type<tc>, window_params = [{transform_indices = @transform_0, window_bounds = array<i64: 1, 18, 18, 4>}, {pipeline_mode = #tpu.pipeline_mode<synchronous>, transform_indices = @transform_1, window_bounds = array<i64: 9, 4, 128>}, {transform_indices = @transform_2, window_bounds = array<i64: 1, 16, 16, 128>}, {transform_indices = @transform_3, window_bounds = array<i64: 1, 1, 128>}, {transform_indices = @transform_4, window_bounds = array<i64: 1, 1, 128>}]} {
    %c0 = arith.constant 0 : index
    %c0_0 = arith.constant 0 : index
    %c0_1 = arith.constant 0 : index
    %c0_2 = arith.constant 0 : index
    %0 = vector.load %arg1[%c0, %c0_0, %c0_1, %c0_2] : memref<1x18x18x4xbf16, #tpu.memory_space<vmem>>, vector<1x18x18x4xbf16>
    %1 = vector.shape_cast %0 : vector<1x18x18x4xbf16> to vector<18x18x4xbf16>
    %cst = arith.constant 0.000000e+00 : f32
    %2 = vector.broadcast %cst : f32 to vector<256x128xf32>
    %3 = vector.extract_strided_slice %1 {offsets = [0, 0, 0], sizes = [16, 16, 4], strides = [1, 1, 1]} : vector<18x18x4xbf16> to vector<16x16x4xbf16>
    %4 = vector.shape_cast %3 : vector<16x16x4xbf16> to vector<256x4xbf16>
    %c0_3 = arith.constant 0 : index
    %c0_4 = arith.constant 0 : index
    %c0_5 = arith.constant 0 : index
    %5 = vector.load %arg2[%c0_3, %c0_4, %c0_5] : memref<9x4x128xbf16, #tpu.memory_space<vmem>>, vector<1x4x128xbf16>
    %6 = vector.shape_cast %5 : vector<1x4x128xbf16> to vector<4x128xbf16>
    %cst_6 = arith.constant dense<0.000000e+00> : vector<256x128xf32>
    %7 = tpu.matmul %4, %6, %cst_6 {dimension_numbers = #tpu.dot_dimension_numbers<[1], [0], [0], [1], [0, 0, 1, 1], [], []>} : vector<256x4xbf16>, vector<4x128xbf16>, vector<256x128xf32> -> vector<256x128xf32>
    %8 = arith.addf %2, %7 : vector<256x128xf32>
    %9 = vector.extract_strided_slice %1 {offsets = [0, 1, 0], sizes = [16, 16, 4], strides = [1, 1, 1]} : vector<18x18x4xbf16> to vector<16x16x4xbf16>
    %10 = vector.shape_cast %9 : vector<16x16x4xbf16> to vector<256x4xbf16>
    %c1 = arith.constant 1 : index
    %c0_7 = arith.constant 0 : index
    %c0_8 = arith.constant 0 : index
    %11 = vector.load %arg2[%c1, %c0_7, %c0_8] : memref<9x4x128xbf16, #tpu.memory_space<vmem>>, vector<1x4x128xbf16>
    %12 = vector.shape_cast %11 : vector<1x4x128xbf16> to vector<4x128xbf16>
    %cst_9 = arith.constant dense<0.000000e+00> : vector<256x128xf32>
    %13 = tpu.matmul %10, %12, %cst_9 {dimension_numbers = #tpu.dot_dimension_numbers<[1], [0], [0], [1], [0, 0, 1, 1], [], []>} : vector<256x4xbf16>, vector<4x128xbf16>, vector<256x128xf32> -> vector<256x128xf32>
    %14 = arith.addf %8, %13 : vector<256x128xf32>
    %15 = vector.extract_strided_slice %1 {offsets = [0, 2, 0], sizes = [16, 16, 4], strides = [1, 1, 1]} : vector<18x18x4xbf16> to vector<16x16x4xbf16>
    %16 = vector.shape_cast %15 : vector<16x16x4xbf16> to vector<256x4xbf16>
    %c2 = arith.constant 2 : index
    %c0_10 = arith.constant 0 : index
    %c0_11 = arith.constant 0 : index
    %17 = vector.load %arg2[%c2, %c0_10, %c0_11] : memref<9x4x128xbf16, #tpu.memory_space<vmem>>, vector<1x4x128xbf16>
    %18 = vector.shape_cast %17 : vector<1x4x128xbf16> to vector<4x128xbf16>
    %cst_12 = arith.constant dense<0.000000e+00> : vector<256x128xf32>
    %19 = tpu.matmul %16, %18, %cst_12 {dimension_numbers = #tpu.dot_dimension_numbers<[1], [0], [0], [1], [0, 0, 1, 1], [], []>} : vector<256x4xbf16>, vector<4x128xbf16>, vector<256x128xf32> -> vector<256x128xf32>
    %20 = arith.addf %14, %19 : vector<256x128xf32>
    %21 = vector.extract_strided_slice %1 {offsets = [1, 0, 0], sizes = [16, 16, 4], strides = [1, 1, 1]} : vector<18x18x4xbf16> to vector<16x16x4xbf16>
    %22 = vector.shape_cast %21 : vector<16x16x4xbf16> to vector<256x4xbf16>
    %c3 = arith.constant 3 : index
    %c0_13 = arith.constant 0 : index
    %c0_14 = arith.constant 0 : index
    %23 = vector.load %arg2[%c3, %c0_13, %c0_14] : memref<9x4x128xbf16, #tpu.memory_space<vmem>>, vector<1x4x128xbf16>
    %24 = vector.shape_cast %23 : vector<1x4x128xbf16> to vector<4x128xbf16>
    %cst_15 = arith.constant dense<0.000000e+00> : vector<256x128xf32>
    %25 = tpu.matmul %22, %24, %cst_15 {dimension_numbers = #tpu.dot_dimension_numbers<[1], [0], [0], [1], [0, 0, 1, 1], [], []>} : vector<256x4xbf16>, vector<4x128xbf16>, vector<256x128xf32> -> vector<256x128xf32>
    %26 = arith.addf %20, %25 : vector<256x128xf32>
    %27 = vector.extract_strided_slice %1 {offsets = [1, 1, 0], sizes = [16, 16, 4], strides = [1, 1, 1]} : vector<18x18x4xbf16> to vector<16x16x4xbf16>
    %28 = vector.shape_cast %27 : vector<16x16x4xbf16> to vector<256x4xbf16>
    %c4 = arith.constant 4 : index
    %c0_16 = arith.constant 0 : index
    %c0_17 = arith.constant 0 : index
    %29 = vector.load %arg2[%c4, %c0_16, %c0_17] : memref<9x4x128xbf16, #tpu.memory_space<vmem>>, vector<1x4x128xbf16>
    %30 = vector.shape_cast %29 : vector<1x4x128xbf16> to vector<4x128xbf16>
    %cst_18 = arith.constant dense<0.000000e+00> : vector<256x128xf32>
    %31 = tpu.matmul %28, %30, %cst_18 {dimension_numbers = #tpu.dot_dimension_numbers<[1], [0], [0], [1], [0, 0, 1, 1], [], []>} : vector<256x4xbf16>, vector<4x128xbf16>, vector<256x128xf32> -> vector<256x128xf32>
    %32 = arith.addf %26, %31 : vector<256x128xf32>
    %33 = vector.extract_strided_slice %1 {offsets = [1, 2, 0], sizes = [16, 16, 4], strides = [1, 1, 1]} : vector<18x18x4xbf16> to vector<16x16x4xbf16>
    %34 = vector.shape_cast %33 : vector<16x16x4xbf16> to vector<256x4xbf16>
    %c5 = arith.constant 5 : index
    %c0_19 = arith.constant 0 : index
    %c0_20 = arith.constant 0 : index
    %35 = vector.load %arg2[%c5, %c0_19, %c0_20] : memref<9x4x128xbf16, #tpu.memory_space<vmem>>, vector<1x4x128xbf16>
    %36 = vector.shape_cast %35 : vector<1x4x128xbf16> to vector<4x128xbf16>
    %cst_21 = arith.constant dense<0.000000e+00> : vector<256x128xf32>
    %37 = tpu.matmul %34, %36, %cst_21 {dimension_numbers = #tpu.dot_dimension_numbers<[1], [0], [0], [1], [0, 0, 1, 1], [], []>} : vector<256x4xbf16>, vector<4x128xbf16>, vector<256x128xf32> -> vector<256x128xf32>
    %38 = arith.addf %32, %37 : vector<256x128xf32>
    %39 = vector.extract_strided_slice %1 {offsets = [2, 0, 0], sizes = [16, 16, 4], strides = [1, 1, 1]} : vector<18x18x4xbf16> to vector<16x16x4xbf16>
    %40 = vector.shape_cast %39 : vector<16x16x4xbf16> to vector<256x4xbf16>
    %c6 = arith.constant 6 : index
    %c0_22 = arith.constant 0 : index
    %c0_23 = arith.constant 0 : index
    %41 = vector.load %arg2[%c6, %c0_22, %c0_23] : memref<9x4x128xbf16, #tpu.memory_space<vmem>>, vector<1x4x128xbf16>
    %42 = vector.shape_cast %41 : vector<1x4x128xbf16> to vector<4x128xbf16>
    %cst_24 = arith.constant dense<0.000000e+00> : vector<256x128xf32>
    %43 = tpu.matmul %40, %42, %cst_24 {dimension_numbers = #tpu.dot_dimension_numbers<[1], [0], [0], [1], [0, 0, 1, 1], [], []>} : vector<256x4xbf16>, vector<4x128xbf16>, vector<256x128xf32> -> vector<256x128xf32>
    %44 = arith.addf %38, %43 : vector<256x128xf32>
    %45 = vector.extract_strided_slice %1 {offsets = [2, 1, 0], sizes = [16, 16, 4], strides = [1, 1, 1]} : vector<18x18x4xbf16> to vector<16x16x4xbf16>
    %46 = vector.shape_cast %45 : vector<16x16x4xbf16> to vector<256x4xbf16>
    %c7 = arith.constant 7 : index
    %c0_25 = arith.constant 0 : index
    %c0_26 = arith.constant 0 : index
    %47 = vector.load %arg2[%c7, %c0_25, %c0_26] : memref<9x4x128xbf16, #tpu.memory_space<vmem>>, vector<1x4x128xbf16>
    %48 = vector.shape_cast %47 : vector<1x4x128xbf16> to vector<4x128xbf16>
    %cst_27 = arith.constant dense<0.000000e+00> : vector<256x128xf32>
    %49 = tpu.matmul %46, %48, %cst_27 {dimension_numbers = #tpu.dot_dimension_numbers<[1], [0], [0], [1], [0, 0, 1, 1], [], []>} : vector<256x4xbf16>, vector<4x128xbf16>, vector<256x128xf32> -> vector<256x128xf32>
    %50 = arith.addf %44, %49 : vector<256x128xf32>
    %51 = vector.extract_strided_slice %1 {offsets = [2, 2, 0], sizes = [16, 16, 4], strides = [1, 1, 1]} : vector<18x18x4xbf16> to vector<16x16x4xbf16>
    %52 = vector.shape_cast %51 : vector<16x16x4xbf16> to vector<256x4xbf16>
    %c8 = arith.constant 8 : index
    %c0_28 = arith.constant 0 : index
    %c0_29 = arith.constant 0 : index
    %53 = vector.load %arg2[%c8, %c0_28, %c0_29] : memref<9x4x128xbf16, #tpu.memory_space<vmem>>, vector<1x4x128xbf16>
    %54 = vector.shape_cast %53 : vector<1x4x128xbf16> to vector<4x128xbf16>
    %cst_30 = arith.constant dense<0.000000e+00> : vector<256x128xf32>
    %55 = tpu.matmul %52, %54, %cst_30 {dimension_numbers = #tpu.dot_dimension_numbers<[1], [0], [0], [1], [0, 0, 1, 1], [], []>} : vector<256x4xbf16>, vector<4x128xbf16>, vector<256x128xf32> -> vector<256x128xf32>
    %56 = arith.addf %50, %55 : vector<256x128xf32>
    %57 = vector.shape_cast %56 : vector<256x128xf32> to vector<1x16x16x128xf32>
    %58 = arith.truncf %57 : vector<1x16x16x128xf32> to vector<1x16x16x128xbf16>
    %c0_31 = arith.constant 0 : index
    %c0_32 = arith.constant 0 : index
    %c0_33 = arith.constant 0 : index
    %c0_34 = arith.constant 0 : index
    %59 = vector.load %arg3[%c0_31, %c0_32, %c0_33, %c0_34] : memref<1x16x16x128xbf16, #tpu.memory_space<vmem>>, vector<1x16x16x128xbf16>
    tpu.vector_store %arg3[%c0_31, %c0_32, %c0_33, %c0_34], %58 {strides = array<i32>} : memref<1x16x16x128xbf16, #tpu.memory_space<vmem>>, vector<1x16x16x128xbf16>,
    %cst_35 = arith.constant dense<0.000000e+00> : vector<128xf32>
    %60 = vector.multi_reduction <add>, %56, %cst_35 [0] : vector<256x128xf32> to vector<128xf32>
    %61 = vector.shape_cast %60 : vector<128xf32> to vector<1x128xf32>
    %62 = vector.shape_cast %61 : vector<1x128xf32> to vector<1x1x128xf32>
    %c0_36 = arith.constant 0 : index
    %c0_37 = arith.constant 0 : index
    %c0_38 = arith.constant 0 : index
    %63 = vector.load %arg4[%c0_36, %c0_37, %c0_38] : memref<1x1x128xf32, #tpu.memory_space<vmem>>, vector<1x1x128xf32>
    tpu.vector_store %arg4[%c0_36, %c0_37, %c0_38], %62 {strides = array<i32>} : memref<1x1x128xf32, #tpu.memory_space<vmem>>, vector<1x1x128xf32>,
    %64 = arith.mulf %56, %56 : vector<256x128xf32>
    %cst_39 = arith.constant dense<0.000000e+00> : vector<128xf32>
    %65 = vector.multi_reduction <add>, %64, %cst_39 [0] : vector<256x128xf32> to vector<128xf32>
    %66 = vector.shape_cast %65 : vector<128xf32> to vector<1x128xf32>
    %67 = vector.shape_cast %66 : vector<1x128xf32> to vector<1x1x128xf32>
    %c0_40 = arith.constant 0 : index
    %c0_41 = arith.constant 0 : index
    %c0_42 = arith.constant 0 : index
    %68 = vector.load %arg5[%c0_40, %c0_41, %c0_42] : memref<1x1x128xf32, #tpu.memory_space<vmem>>, vector<1x1x128xf32>
    tpu.vector_store %arg5[%c0_40, %c0_41, %c0_42], %67 {strides = array<i32>} : memref<1x1x128xf32, #tpu.memory_space<vmem>>, vector<1x1x128xf32>,
    return
  }
  func.func @transform_0(%arg0: i32) -> (i32, i32, i32, i32) {
    %c0_i32 = arith.constant 0 : i32
    %c0_i32_0 = arith.constant 0 : i32
    %c0_i32_1 = arith.constant 0 : i32
    %c0_i32_2 = arith.constant 0 : i32
    return %arg0, %c0_i32, %c0_i32_0, %c0_i32_1 : i32, i32, i32, i32
  }
  func.func @transform_1(%arg0: i32) -> (i32, i32, i32) {
    %c0_i32 = arith.constant 0 : i32
    %c0_i32_0 = arith.constant 0 : i32
    %c0_i32_1 = arith.constant 0 : i32
    %c0_i32_2 = arith.constant 0 : i32
    return %c0_i32, %c0_i32_0, %c0_i32_1 : i32, i32, i32
  }
  func.func @transform_2(%arg0: i32) -> (i32, i32, i32, i32) {
    %c0_i32 = arith.constant 0 : i32
    %c0_i32_0 = arith.constant 0 : i32
    %c0_i32_1 = arith.constant 0 : i32
    %c0_i32_2 = arith.constant 0 : i32
    return %arg0, %c0_i32, %c0_i32_0, %c0_i32_1 : i32, i32, i32, i32
  }
  func.func @transform_3(%arg0: i32) -> (i32, i32, i32) {
    %c0_i32 = arith.constant 0 : i32
    %c0_i32_0 = arith.constant 0 : i32
    %c0_i32_1 = arith.constant 0 : i32
    return %arg0, %c0_i32, %c0_i32_0 : i32, i32, i32
  }
  func.func @transform_4(%arg0: i32) -> (i32, i32, i32) {
    %c0_i32 = arith.constant 0 : i32
    %c0_i32_0 = arith.constant 0 : i32
    %c0_i32_1 = arith.constant 0 : i32
    return %arg0, %c0_i32, %c0_i32_0 : i32, i32, i32
  }
}

module attributes {stable_mosaic.version = 11 : i64} {
  func.func @_affine_act_kernel(%arg0: i32, %arg1: memref<1x16x16x128xbf16, #tpu.memory_space<vmem>>, %arg2: memref<1x1x1x128xf32, #tpu.memory_space<vmem>>, %arg3: memref<1x1x1x128xf32, #tpu.memory_space<vmem>>, %arg4: memref<1x16x16x128xf32, #tpu.memory_space<vmem>>) attributes {dimension_semantics = [#tpu.dimension_semantics<parallel>], iteration_bounds = array<i64: 2>, scalar_prefetch = 0 : i64, scratch_operands = 0 : i64, tpu.core_type = #tpu.core_type<tc>, window_params = [{transform_indices = @transform_0, window_bounds = array<i64: 1, 16, 16, 128>}, {pipeline_mode = #tpu.pipeline_mode<synchronous>, transform_indices = @transform_1, window_bounds = array<i64: 1, 1, 1, 128>}, {pipeline_mode = #tpu.pipeline_mode<synchronous>, transform_indices = @transform_2, window_bounds = array<i64: 1, 1, 1, 128>}, {transform_indices = @transform_3, window_bounds = array<i64: 1, 16, 16, 128>}]} {
    %c0 = arith.constant 0 : index
    %c0_0 = arith.constant 0 : index
    %c0_1 = arith.constant 0 : index
    %c0_2 = arith.constant 0 : index
    %0 = vector.load %arg1[%c0, %c0_0, %c0_1, %c0_2] : memref<1x16x16x128xbf16, #tpu.memory_space<vmem>>, vector<1x16x16x128xbf16>
    %1 = arith.extf %0 : vector<1x16x16x128xbf16> to vector<1x16x16x128xf32>
    %c0_3 = arith.constant 0 : index
    %c0_4 = arith.constant 0 : index
    %c0_5 = arith.constant 0 : index
    %c0_6 = arith.constant 0 : index
    %2 = vector.load %arg2[%c0_3, %c0_4, %c0_5, %c0_6] : memref<1x1x1x128xf32, #tpu.memory_space<vmem>>, vector<1x1x1x128xf32>
    %3 = vector.broadcast %2 : vector<1x1x1x128xf32> to vector<1x16x16x128xf32>
    %4 = arith.mulf %1, %3 : vector<1x16x16x128xf32>
    %c0_7 = arith.constant 0 : index
    %c0_8 = arith.constant 0 : index
    %c0_9 = arith.constant 0 : index
    %c0_10 = arith.constant 0 : index
    %5 = vector.load %arg3[%c0_7, %c0_8, %c0_9, %c0_10] : memref<1x1x1x128xf32, #tpu.memory_space<vmem>>, vector<1x1x1x128xf32>
    %6 = vector.broadcast %5 : vector<1x1x1x128xf32> to vector<1x16x16x128xf32>
    %7 = arith.addf %4, %6 : vector<1x16x16x128xf32>
    %cst = arith.constant 0.000000e+00 : f32
    %8 = vector.broadcast %cst : f32 to vector<1x16x16x128xf32>
    %9 = arith.maximumf %7, %8 : vector<1x16x16x128xf32>
    %c0_11 = arith.constant 0 : index
    %c0_12 = arith.constant 0 : index
    %c0_13 = arith.constant 0 : index
    %c0_14 = arith.constant 0 : index
    %10 = vector.load %arg4[%c0_11, %c0_12, %c0_13, %c0_14] : memref<1x16x16x128xf32, #tpu.memory_space<vmem>>, vector<1x16x16x128xf32>
    tpu.vector_store %arg4[%c0_11, %c0_12, %c0_13, %c0_14], %9 {strides = array<i32>} : memref<1x16x16x128xf32, #tpu.memory_space<vmem>>, vector<1x16x16x128xf32>,
    return
  }
  func.func @transform_0(%arg0: i32) -> (i32, i32, i32, i32) {
    %c0_i32 = arith.constant 0 : i32
    %c0_i32_0 = arith.constant 0 : i32
    %c0_i32_1 = arith.constant 0 : i32
    %c0_i32_2 = arith.constant 0 : i32
    return %arg0, %c0_i32, %c0_i32_0, %c0_i32_1 : i32, i32, i32, i32
  }
  func.func @transform_1(%arg0: i32) -> (i32, i32, i32, i32) {
    %c0_i32 = arith.constant 0 : i32
    %c0_i32_0 = arith.constant 0 : i32
    %c0_i32_1 = arith.constant 0 : i32
    %c0_i32_2 = arith.constant 0 : i32
    %c0_i32_3 = arith.constant 0 : i32
    return %c0_i32, %c0_i32_0, %c0_i32_1, %c0_i32_2 : i32, i32, i32, i32
  }
  func.func @transform_2(%arg0: i32) -> (i32, i32, i32, i32) {
    %c0_i32 = arith.constant 0 : i32
    %c0_i32_0 = arith.constant 0 : i32
    %c0_i32_1 = arith.constant 0 : i32
    %c0_i32_2 = arith.constant 0 : i32
    %c0_i32_3 = arith.constant 0 : i32
    return %c0_i32, %c0_i32_0, %c0_i32_1, %c0_i32_2 : i32, i32, i32, i32
  }
  func.func @transform_3(%arg0: i32) -> (i32, i32, i32, i32) {
    %c0_i32 = arith.constant 0 : i32
    %c0_i32_0 = arith.constant 0 : i32
    %c0_i32_1 = arith.constant 0 : i32
    %c0_i32_2 = arith.constant 0 : i32
    return %arg0, %c0_i32, %c0_i32_0, %c0_i32_1 : i32, i32, i32, i32
  }
}

</mosaic_0001>

<bundles_post_ra>
// kernel: conv2d_bn_relu.3
= control target key start
LH: loop header
LB: loop body
LE: loop exit
PB: predicated region body
PF: predicated region fallthrough
CT: control target
= control target key end

     0   :  { %s562_s12 = smov 0   ;;  %s709_s0 = inlined_call_operand.vmem [shape: bf16[2,16,16,128], index: 0, kind: input, shape index: {}]   ;;  %s710_s1 = inlined_call_operand.vmem [shape: f32[1,1,1,128], index: 1, kind: input, shape index: {}]   ;;  %s711_s2 = inlined_call_operand.vmem [shape: f32[1,1,1,128], index: 2, kind: input, shape index: {}]   ;;  %s712_s3 = inlined_call_operand.vmem [shape: f32[2,16,16,128], index: 3, kind: output, shape index: {}]  }
   0x1 LB: > { %s432_s13 = sadd.s32 4294967295, %s540_s12   ;;  %p436_p0 = scmp.ge.s32.totalorder %s540_s12, 1  ;;  %s540_s12 = sphi %s562_s12, %s13_s12  }
   0x2   : > { %p137_p1 = scmp.lt.s32.totalorder %s540_s12, 3 }
   0x4   : > { %p138_p2 = pnand %p436_p0, %p137_p1 }
   0x5   : > { %p161_p3 = scmp.lt.s32.totalorder (!%p138_p2), %s432_s13, 1  ;;  %v581_v0 = vld [vmem:[%s710_s1] ss:$0 sm:$0xff] (!%p138_p2) }
   0x6   : > { %141 = sbr.rel (%p138_p2) target bundleno = 53 (0x35), region = 32  ;;  %v590_v9 = vld [vmem:[%s711_s2] ss:$0 sm:$0xff] (!%p138_p2) }
   0xd   : > { %s714_s13 = smov (!%p161_p3, %s432_s13), 1 }
   0xe   : > { %s445_s14 = sshll.u32 %s714_s13, 7  ;;  %s446_s22 = sshll.u32 %s714_s13, 8 }
   0xf   : > { %s576_s17 = scalar_lea.vmem %s709_s0, %s445_s14  ;;  %s608_s25 = scalar_lea.vmem %s712_s3, %s446_s22 }
  0x10   : > { %v448_v1 = vld [vmem:[%s576_s17] sm:$0xff]   ;;  %v511_v2 = vld [vmem:[%s576_s17 + $0x8] sm:$0xff]   ;;  %v512_v3 = vld [vmem:[%s576_s17 + $0x10] sm:$0xff]  }
  0x11   : > { %v449_v4 = vunpack.c.l.bf16 %v448_v1  ;;  %v450_v5 = vunpack.c.h.bf16 %v448_v1  ;;  %v453_v6 = vunpack.c.l.bf16 %v511_v2  ;;  %v454_v7 = vunpack.c.h.bf16 %v511_v2  ;;  %v513_v8 = vld [vmem:[%s576_s17 + $0x18] sm:$0xff]   ;;  %v514_v30 = vld [vmem:[%s576_s17 + $0x20] sm:$0xff]   ;;  %v515_v31 = vld [vmem:[%s576_s17 + $0x28] sm:$0xff]  }
  0x12   : > { %v457_v10 = vunpack.c.l.bf16 %v512_v3  ;;  %v458_v11 = vunpack.c.h.bf16 %v512_v3  ;;  %v461_v12 = vunpack.c.l.bf16 %v513_v8  ;;  %v462_v13 = vunpack.c.h.bf16 %v513_v8  ;;  %v516_v36 = vld [vmem:[%s576_s17 + $0x30] sm:$0xff]   ;;  %v517_v37 = vld [vmem:[%s576_s17 + $0x38] sm:$0xff]   ;;  %v518_v3 = vld [vmem:[%s576_s17 + $0x40] sm:$0xff]  }
  0x13   : > { %v242_v14 = vmul.f32 %v449_v4, %v581_v0  ;;  %v243_v15 = vmul.f32 %v450_v5, %v581_v0  ;;  %v244_v16 = vmul.f32 %v453_v6, %v581_v0  ;;  %v245_v17 = vmul.f32 %v454_v7, %v581_v0  ;;  %v519_v4 = vld [vmem:[%s576_s17 + $0x48] sm:$0xff]  }
  0x14   : > { %v246_v18 = vmul.f32 %v457_v10, %v581_v0  ;;  %v247_v19 = vmul.f32 %v458_v11, %v581_v0  ;;  %v248_v20 = vmul.f32 %v461_v12, %v581_v0  ;;  %v249_v21 = vmul.f32 %v462_v13, %v581_v0  ;;  %v520_v10 = vld [vmem:[%s576_s17 + $0x50] sm:$0xff]   ;;  %v521_v11 = vld [vmem:[%s576_s17 + $0x58] sm:$0xff]  }
  0x15   : > { %v281_v22 = vadd.f32 %v590_v9, %v242_v14  ;;  %v282_v23 = vadd.f32 %v590_v9, %v243_v15  ;;  %v283_v24 = vadd.f32 %v590_v9, %v244_v16  ;;  %v284_v25 = vadd.f32 %v590_v9, %v245_v17 }
  0x16   : > { %v285_v26 = vadd.f32 %v590_v9, %v246_v18  ;;  %v286_v27 = vadd.f32 %v590_v9, %v247_v19  ;;  %v287_v28 = vadd.f32 %v590_v9, %v248_v20  ;;  %v288_v29 = vadd.f32 %v590_v9, %v249_v21 }
  0x17   : > { %v313_v32 = vmax.f32 %v281_v22, 0.0  ;;  %v314_v33 = vmax.f32 %v282_v23, 0.0  ;;  %v315_v34 = vmax.f32 %v283_v24, 0.0  ;;  %v316_v35 = vmax.f32 %v284_v25, 0.0 }
  0x18   : > { %v317_v38 = vmax.f32 %v285_v26, 0.0  ;;  %v318_v39 = vmax.f32 %v286_v27, 0.0  ;;  %v319_v40 = vmax.f32 %v287_v28, 0.0  ;;  %v320_v41 = vmax.f32 %v288_v29, 0.0 }
  0x19   : > { %345 = vst [vmem:[%s608_s25] sm:$0xff] %v313_v32  ;;  %346 = vst [vmem:[%s608_s25 + $0x8] sm:$0xff] %v314_v33  ;;  %v465_v42 = vunpack.c.l.bf16 %v514_v30  ;;  %v466_v43 = vunpack.c.h.bf16 %v514_v30  ;;  %v469_v44 = vunpack.c.l.bf16 %v515_v31  ;;  %v470_v45 = vunpack.c.h.bf16 %v515_v31 }
  0x1a   : > { %347 = vst [vmem:[%s608_s25 + $0x10] sm:$0xff] %v315_v34  ;;  %348 = vst [vmem:[%s608_s25 + $0x18] sm:$0xff] %v316_v35  ;;  %v473_v46 = vunpack.c.l.bf16 %v516_v36  ;;  %v474_v47 = vunpack.c.h.bf16 %v516_v36  ;;  %v477_v48 = vunpack.c.l.bf16 %v517_v37  ;;  %v478_v49 = vunpack.c.h.bf16 %v517_v37 }
  0x1b   : > { %349 = vst [vmem:[%s608_s25 + $0x20] sm:$0xff] %v317_v38  ;;  %350 = vst [vmem:[%s608_s25 + $0x28] sm:$0xff] %v318_v39  ;;  %v250_v50 = vmul.f32 %v465_v42, %v581_v0  ;;  %v251_v51 = vmul.f32 %v466_v43, %v581_v0  ;;  %v252_v52 = vmul.f32 %v469_v44, %v581_v0  ;;  %v481_v16 = vunpack.c.l.bf16 %v518_v3 }
  0x1c   : > { %351 = vst [vmem:[%s608_s25 + $0x30] sm:$0xff] %v319_v40  ;;  %352 = vst [vmem:[%s608_s25 + $0x38] sm:$0xff] %v320_v41  ;;  %v253_v53 = vmul.f32 %v470_v45, %v581_v0  ;;  %v254_v54 = vmul.f32 %v473_v46, %v581_v0  ;;  %v255_v55 = vmul.f32 %v474_v47, %v581_v0  ;;  %v482_v17 = vunpack.c.h.bf16 %v518_v3  ;;  %v522_v40 = vld [vmem:[%s576_s17 + $0x60] sm:$0xff]   ;;  %v523_v41 = vld [vmem:[%s576_s17 + $0x68] sm:$0xff]  }
  0x1d   : > { %v256_v56 = vmul.f32 %v477_v48, %v581_v0  ;;  %v257_v57 = vmul.f32 %v478_v49, %v581_v0  ;;  %v289_v58 = vadd.f32 %v590_v9, %v250_v50  ;;  %v290_v59 = vadd.f32 %v590_v9, %v251_v51  ;;  %v524_v46 = vld [vmem:[%s576_s17 + $0x70] sm:$0xff]   ;;  %v525_v47 = vld [vmem:[%s576_s17 + $0x78] sm:$0xff]  }
  0x1e   : > { %v291_v60 = vadd.f32 %v590_v9, %v252_v52  ;;  %v292_v61 = vadd.f32 %v590_v9, %v253_v53  ;;  %v293_v62 = vadd.f32 %v590_v9, %v254_v54  ;;  %v294_v63 = vadd.f32 %v590_v9, %v255_v55 }
  0x1f   : > { %v295_v1 = vadd.f32 %v590_v9, %v256_v56  ;;  %v296_v2 = vadd.f32 %v590_v9, %v257_v57  ;;  %v321_v5 = vmax.f32 %v289_v58, 0.0  ;;  %v322_v6 = vmax.f32 %v290_v59, 0.0 }
  0x20   : > { %v323_v7 = vmax.f32 %v291_v60, 0.0  ;;  %v324_v8 = vmax.f32 %v292_v61, 0.0  ;;  %v325_v12 = vmax.f32 %v293_v62, 0.0  ;;  %v326_v13 = vmax.f32 %v294_v63, 0.0 }
  0x21   : > { %v327_v14 = vmax.f32 %v295_v1, 0.0  ;;  %v328_v15 = vmax.f32 %v296_v2, 0.0  ;;  %353 = vst [vmem:[%s608_s25 + $0x40] sm:$0xff] %v321_v5  ;;  %354 = vst [vmem:[%s608_s25 + $0x48] sm:$0xff] %v322_v6  ;;  %v485_v18 = vunpack.c.l.bf16 %v519_v4  ;;  %v486_v19 = vunpack.c.h.bf16 %v519_v4 }
  0x22   : > { %355 = vst [vmem:[%s608_s25 + $0x50] sm:$0xff] %v323_v7  ;;  %356 = vst [vmem:[%s608_s25 + $0x58] sm:$0xff] %v324_v8  ;;  %v489_v20 = vunpack.c.l.bf16 %v520_v10  ;;  %v490_v21 = vunpack.c.h.bf16 %v520_v10  ;;  %v493_v22 = vunpack.c.l.bf16 %v521_v11  ;;  %v494_v23 = vunpack.c.h.bf16 %v521_v11 }
  0x23   : > { %357 = vst [vmem:[%s608_s25 + $0x60] sm:$0xff] %v325_v12  ;;  %358 = vst [vmem:[%s608_s25 + $0x68] sm:$0xff] %v326_v13  ;;  %v258_v24 = vmul.f32 %v481_v16, %v581_v0  ;;  %v259_v25 = vmul.f32 %v482_v17, %v581_v0  ;;  %v260_v26 = vmul.f32 %v485_v18, %v581_v0  ;;  %v497_v52 = vunpack.c.l.bf16 %v522_v40 }
  0x24   : > { %359 = vst [vmem:[%s608_s25 + $0x70] sm:$0xff] %v327_v14  ;;  %360 = vst [vmem:[%s608_s25 + $0x78] sm:$0xff] %v328_v15  ;;  %v261_v27 = vmul.f32 %v486_v19, %v581_v0  ;;  %v262_v28 = vmul.f32 %v489_v20, %v581_v0  ;;  %v263_v29 = vmul.f32 %v490_v21, %v581_v0  ;;  %v498_v53 = vunpack.c.h.bf16 %v522_v40 }
  0x25   : > { %v264_v30 = vmul.f32 %v493_v22, %v581_v0  ;;  %v265_v31 = vmul.f32 %v494_v23, %v581_v0  ;;  %v297_v32 = vadd.f32 %v590_v9, %v258_v24  ;;  %v298_v33 = vadd.f32 %v590_v9, %v259_v25 }
  0x26   : > { %v299_v34 = vadd.f32 %v590_v9, %v260_v26  ;;  %v300_v35 = vadd.f32 %v590_v9, %v261_v27  ;;  %v301_v36 = vadd.f32 %v590_v9, %v262_v28  ;;  %v302_v37 = vadd.f32 %v590_v9, %v263_v29 }
  0x27   : > { %v303_v38 = vadd.f32 %v590_v9, %v264_v30  ;;  %v304_v39 = vadd.f32 %v590_v9, %v265_v31  ;;  %v329_v42 = vmax.f32 %v297_v32, 0.0  ;;  %v330_v43 = vmax.f32 %v298_v33, 0.0 }
  0x28   : > { %v331_v44 = vmax.f32 %v299_v34, 0.0  ;;  %v332_v45 = vmax.f32 %v300_v35, 0.0  ;;  %v333_v48 = vmax.f32 %v301_v36, 0.0  ;;  %v334_v49 = vmax.f32 %v302_v37, 0.0 }
  0x29   : > { %v335_v50 = vmax.f32 %v303_v38, 0.0  ;;  %v336_v51 = vmax.f32 %v304_v39, 0.0  ;;  %361 = vst [vmem:[%s608_s25 + $0x80] sm:$0xff] %v329_v42  ;;  %362 = vst [vmem:[%s608_s25 + $0x88] sm:$0xff] %v330_v43  ;;  %v501_v54 = vunpack.c.l.bf16 %v523_v41  ;;  %v502_v55 = vunpack.c.h.bf16 %v523_v41 }
  0x2a   : > { %363 = vst [vmem:[%s608_s25 + $0x90] sm:$0xff] %v331_v44  ;;  %364 = vst [vmem:[%s608_s25 + $0x98] sm:$0xff] %v332_v45  ;;  %v505_v56 = vunpack.c.l.bf16 %v524_v46  ;;  %v506_v57 = vunpack.c.h.bf16 %v524_v46  ;;  %v509_v58 = vunpack.c.l.bf16 %v525_v47  ;;  %v510_v59 = vunpack.c.h.bf16 %v525_v47 }
  0x2b   : > { %365 = vst [vmem:[%s608_s25 + $0xa0] sm:$0xff] %v333_v48  ;;  %366 = vst [vmem:[%s608_s25 + $0xa8] sm:$0xff] %v334_v49  ;;  %v266_v60 = vmul.f32 %v497_v52, %v581_v0  ;;  %v267_v61 = vmul.f32 %v498_v53, %v581_v0  ;;  %v268_v62 = vmul.f32 %v501_v54, %v581_v0 }
  0x2c   : > { %367 = vst [vmem:[%s608_s25 + $0xb0] sm:$0xff] %v335_v50  ;;  %368 = vst [vmem:[%s608_s25 + $0xb8] sm:$0xff] %v336_v51  ;;  %v269_v63 = vmul.f32 %v502_v55, %v581_v0  ;;  %v270_v1 = vmul.f32 %v505_v56, %v581_v0  ;;  %v271_v2 = vmul.f32 %v506_v57, %v581_v0 }
  0x2d   : > { %v272_v3 = vmul.f32 %v509_v58, %v581_v0  ;;  %v273_v4 = vmul.f32 %v510_v59, %v581_v0  ;;  %v305_v5 = vadd.f32 %v590_v9, %v266_v60  ;;  %v306_v6 = vadd.f32 %v590_v9, %v267_v61 }
  0x2e   : > { %v307_v7 = vadd.f32 %v590_v9, %v268_v62  ;;  %v308_v8 = vadd.f32 %v590_v9, %v269_v63  ;;  %v309_v10 = vadd.f32 %v590_v9, %v270_v1  ;;  %v310_v11 = vadd.f32 %v590_v9, %v271_v2 }
  0x2f   : > { %v311_v0 = vadd.f32 %v590_v9, %v272_v3  ;;  %v312_v12 = vadd.f32 %v590_v9, %v273_v4  ;;  %v337_v13 = vmax.f32 %v305_v5, 0.0  ;;  %v338_v14 = vmax.f32 %v306_v6, 0.0 }
  0x30   : > { %v339_v15 = vmax.f32 %v307_v7, 0.0  ;;  %v340_v16 = vmax.f32 %v308_v8, 0.0  ;;  %v341_v17 = vmax.f32 %v309_v10, 0.0  ;;  %v342_v18 = vmax.f32 %v310_v11, 0.0 }
  0x31   : > { %v343_v19 = vmax.f32 %v311_v0, 0.0  ;;  %v344_v20 = vmax.f32 %v312_v12, 0.0  ;;  %369 = vst [vmem:[%s608_s25 + $0xc0] sm:$0xff] %v337_v13  ;;  %370 = vst [vmem:[%s608_s25 + $0xc8] sm:$0xff] %v338_v14 }
  0x32   : > { %371 = vst [vmem:[%s608_s25 + $0xd0] sm:$0xff] %v339_v15  ;;  %372 = vst [vmem:[%s608_s25 + $0xd8] sm:$0xff] %v340_v16 }
  0x33   : > { %373 = vst [vmem:[%s608_s25 + $0xe0] sm:$0xff] %v341_v17  ;;  %374 = vst [vmem:[%s608_s25 + $0xe8] sm:$0xff] %v342_v18 }
  0x34   : > { %375 = vst [vmem:[%s608_s25 + $0xf0] sm:$0xff] %v343_v19  ;;  %376 = vst [vmem:[%s608_s25 + $0xf8] sm:$0xff] %v344_v20 }
  0x35 PF: > { %s13_s12 = sadd.s32 1, %s540_s12  }
  0x36   : > { %p10_p4 = scmp.ge.s32.totalorder %s13_s12, 4  }
  0x38   :  { %12 = sbr.rel (!%p10_p4) target bundleno = 1 (0x1), region = 62 }

// kernel: conv2d_bn_relu.2
= control target key start
LH: loop header
LB: loop body
LE: loop exit
PB: predicated region body
PF: predicated region fallthrough
CT: control target
= control target key end

     0   :  { %s4489_s15 = smov 0   ;;  %s5497_s0 = inlined_call_operand.vmem [shape: bf16[2,18,18,4], index: 0, kind: input, shape index: {}]   ;;  %s5498_s1 = inlined_call_operand.vmem [shape: bf16[9,4,128], index: 1, kind: input, shape index: {}]   ;;  %s5499_s2 = inlined_call_operand.vmem [shape: bf16[2,16,16,128], index: 2, kind: output, shape index: {0}]   ;;  %s5500_s3 = inlined_call_operand.vmem [shape: f32[2,1,128], index: 3, kind: output, shape index: {1}]   ;;  %s5501_s4 = inlined_call_operand.vmem [shape: f32[2,1,128], index: 4, kind: output, shape index: {2}]  }
   0x1 LB: > { %s3304_s16 = sadd.s32 4294967295, %s4462_s15   ;;  %p3308_p0 = scmp.ge.s32.totalorder %s4462_s15, 1  ;;  %s4462_s15 = sphi %s4489_s15, %s15_s15  }
   0x2   : > { %p167_p1 = scmp.lt.s32.totalorder %s4462_s15, 3 }
   0x4   : > { %p168_p2 = pnand %p3308_p0, %p167_p1 }
   0x6   : > { %171 = sbr.rel (%p168_p2) target bundleno = 569 (0x239), region = 28 }
   0xd   : > { %v3312_v0 = vld [vmem:[%s5498_s1 + $0x2] sm:$0x3]  ;;  %vm757_vm0 = vcmask 1041408   ;;  %v3444_v1 = vld [vmem:[%s5498_s1 + $0x8] sm:$0x3]  ;;  %p199_p3 = scmp.lt.s32.totalorder %s3304_s16, 1 }
   0xe   : > { %4415 = vmatprep.subr.msk.bf16.mxu1 %vm757_vm0, %v3312_v0  ;;  %4419 = vmatprep.subr.msk.bf16.mxu0 %vm757_vm0, %v3444_v1  ;;  %v759_v2 = vsel %vm757_vm0, %v3312_v0, 0  ;;  %v4507_v3 = vsel %vm757_vm0, %v3444_v1, 0  ;;  %v270_v4 = vld [vmem:[%s5498_s1] sm:$0x3]  ;;  %v3463_v5 = vld [vmem:[%s5498_s1 + $0xa] sm:$0x3] }
   0xf   : > { %5533 = vst [vmem:[#allocation2_spill] sm:$0xff] %v4507_v3  ;;  %3852 = vmatpush3.bf16.msra.mxu1 %v759_v2  ;;  %3988 = vmatpush3.bf16.msra.mxu0 %v4507_v3  ;;  %s5580_s16 = smov (!%p199_p3, %s3304_s16), 1  ;;  %vm271_vm1 = vsmask.f32 3328  ;;  %vm272_vm2 = vsmask.f32 7440 }
  0x10   : > { %4416 = vmatprep.subr.msk.bf16.mxu1 %vm757_vm0, %v270_v4  ;;  %4421 = vmatprep.subr.msk.bf16.mxu0 %vm757_vm0, %v3463_v5  ;;  %s4425_s25 = smul.u32 216, %s5580_s16  ;;  %v4527_v6 = vsel %vm757_vm0, %v270_v4, 0  ;;  %v4530_v7 = vsel %vm757_vm0, %v3463_v5, 0  ;;  %v4535_v8 = vld [vmem:[%s5498_s1 + $0xc] sm:$0x3]  ;;  %vm708_vm3 = vcmask 31744   ;;  %vm4571_vm4 = vmor %vm271_vm1, %vm272_vm2  ;;  %s211_s23 = scalar_lea.vmem %s5500_s3, %s5580_s16 }
  0x11   : > { %v4559_v20 = vsel %vm757_vm0, %v4535_v8, 0  ;;  %vm1230_vm5 = vcmask 1042432   ;;  %vm1231_vm6 = vcmask 1046532   ;;  %s3570_s17 = sshll.u32 %s5580_s16, 7  ;;  %s214_s26 = scalar_lea.vmem %s5501_s4, %s5580_s16 }
  0x12   : > { %s4524_s28 = scalar_lea.vmem %s5497_s0, %s4425_s25  ;;  %vm4752_vm7 = vmor %vm1230_vm5, %vm1231_vm6  ;;  %s5464_s20 = scalar_lea.vmem %s5499_s2, %s3570_s17 }
  0x13   : > { %v4538_v9 = vld [vmem:[%s4524_s28] sm:$0xf]  ;;  %v4541_v10 = vld [vmem:[%s4524_s28 + $0x4] sm:$0xf]  ;;  %v218_v11 = vld [vmem:[%s4524_s28 + $0x8] sm:$0x1] }
  0x14   : > { %v275_v12 = vshrl.u32 %v4538_v9, 16  ;;  %v278_v13 = vshll.u32 %v4538_v9, 16  ;;  %v284_v14 = vshll.u32 %v4541_v10, 16  ;;  %v288_v15 = vshrl.u32 %v4541_v10, 16  ;;  %v4549_v16 = vld [vmem:[%s4524_s28 + $0xc] sm:$0xf] }
  0x15   : > { %v294_v17 = vshll.u32 %v218_v11, 16  ;;  %v4552_v18 = vld [vmem:[%s4524_s28 + $0x10] sm:$0xf]  ;;  %v4555_v19 = vld [vmem:[%s4524_s28 + $0x14] sm:$0x1]  ;;  %v299_v26 = vshrl.u32 %v4549_v16, 16 }
  0x16   : > { %v277_v21 = vrot.slane %v275_v12, 4  ;;  %v280_v22 = vrot.slane %v278_v13, 5  ;;  %v286_v23 = vrot.slane %v284_v14, 5  ;;  %v290_v24 = vrot.slane %v288_v15, 4  ;;  %v4567_v33 = vld [vmem:[%s4524_s28 + $0x18] sm:$0xf] }
  0x17   : > { %v296_v25 = vrot.slane %v294_v17, 5  ;;  %v302_v27 = vshll.u32 %v4549_v16, 16  ;;  %v308_v28 = vshll.u32 %v4552_v18, 16  ;;  %v312_v31 = vshrl.u32 %v4552_v18, 16  ;;  %v4580_v39 = vld [vmem:[%s4524_s28 + $0x1c] sm:$0xf] }
  0x18   : > { %v281_v29 = vor.u32 %v280_v22, %v277_v21  ;;  %v291_v30 = vor.u32 %v290_v24, %v286_v23  ;;  %v318_v32 = vshll.u32 %v4555_v19, 16  ;;  %v301_v35 = vrot.slane %v299_v26, 4  ;;  %v4584_v46 = vld [vmem:[%s4524_s28 + $0x20] sm:$0x1]  ;;  %v4594_v57 = vld [vmem:[%s4524_s28 + $0x24] sm:$0xf] }
  0x19   : > { %v304_v36 = vrot.slane %v302_v27, 5  ;;  %v310_v37 = vrot.slane %v308_v28, 5  ;;  %v4577_v38 = vcombine.low %v4549_v16, %v4552_v18  ;;  %v314_v42 = vrot.slane %v312_v31, 4  ;;  %v4599_v62 = vld [vmem:[%s4524_s28 + $0x28] sm:$0xf] }
  0x1a   : > { %v282_v40 = vrot.slane %v281_v29, 4  ;;  %v292_v41 = vrot.slane %v291_v30, 4  ;;  %v320_v43 = vrot.slane %v318_v32, 5  ;;  %v1245_v45 = vrot.slane %v4555_v19, 5  ;;  %v4607_v4 = vld [vmem:[%s4524_s28 + $0x2c] sm:$0x1] }
  0x1b   : > { %v305_v44 = vor.u32 %v304_v36, %v301_v35  ;;  %v323_v47 = vshrl.u32 %v4567_v33, 16  ;;  %v326_v48 = vshll.u32 %v4567_v33, 16  ;;  %v315_v51 = vor.u32 %v314_v42, %v310_v37  ;;  %v4613_v14 = vld [vmem:[%s4524_s28 + $0x30] sm:$0xf]  ;;  %v4625_v28 = vld [vmem:[%s4524_s28 + $0x34] sm:$0xf] }
  0x1c   : > { %v287_v49 = vsel %vm4571_vm4, %v282_v40, %v286_v23  ;;  %v297_v50 = vsel %vm4571_vm4, %v292_v41, %v296_v25  ;;  %v332_v52 = vshll.u32 %v4580_v39, 16  ;;  %v336_v60 = vshrl.u32 %v4580_v39, 16  ;;  %v4620_v23 = vld [vmem:[%s5498_s1 + $0x4] sm:$0x3]  ;;  %v4632_v32 = vld [vmem:[%s4524_s28 + $0x38] sm:$0x1] }
  0x1d   : > { %v3313_v53 = vcombine.low %v287_v49, %v297_v50  ;;  %v306_v54 = vrot.slane %v305_v44, 4  ;;  %v325_v55 = vrot.slane %v323_v47, 4  ;;  %v328_v56 = vrot.slane %v326_v48, 5  ;;  %v4640_v48 = vld [vmem:[%s4524_s28 + $0x3c] sm:$0xf] }
  0x1e   : > { %v316_v58 = vrot.slane %v315_v51, 4  ;;  %v334_v59 = vrot.slane %v332_v52, 5  ;;  %v342_v61 = vshll.u32 %v4584_v46, 16  ;;  %v1249_v1 = vrot.slane %v4580_v39, 5  ;;  %v4648_v52 = vld [vmem:[%s4524_s28 + $0x40] sm:$0xf] }
  0x1f   : > { %3853 = vmatprep.mubr.msk.bf16.mxu1 %vm708_vm3, %v3313_v53  ;;  %v311_v63 = vsel %vm4571_vm4, %v306_v54, %v310_v37  ;;  %v329_v0 = vor.u32 %v328_v56, %v325_v55  ;;  %v1252_v2 = vrot.slane %v4584_v46, 5  ;;  %v338_v11 = vrot.slane %v336_v60, 4 }
  0x20   : > { %v321_v5 = vsel %vm4571_vm4, %v316_v58, %v320_v43  ;;  %v344_v12 = vrot.slane %v342_v61, 5  ;;  %v347_v13 = vshrl.u32 %v4594_v57, 16  ;;  %v350_v21 = vshll.u32 %v4594_v57, 16 }
  0x21   : > { %v3314_v15 = vcombine.low %v311_v63, %v321_v5  ;;  %v330_v17 = vrot.slane %v329_v0, 4  ;;  %v356_v22 = vshll.u32 %v4599_v62, 16  ;;  %v339_v24 = vor.u32 %v338_v11, %v334_v59  ;;  %v4660_v5 = vld [vmem:[%s4524_s28 + $0x44] sm:$0x1] }
  0x22   : > { %v349_v25 = vrot.slane %v347_v13, 4  ;;  %v360_v26 = vshrl.u32 %v4599_v62, 16  ;;  %v366_v27 = vshll.u32 %v4607_v4, 16  ;;  %v352_v30 = vrot.slane %v350_v21, 5  ;;  %v4665_v13 = vld [vmem:[%s4524_s28 + $0x48] sm:$0xf] }
  0x23   : > { %3989 = vmatprep.mubr.msk.bf16.mxu0 %vm708_vm3, %v3314_v15  ;;  %3854 = vmatmul.mubr.msk.bf16.vlgmr.msra.gmra.mrb[0].mxu1 %vm708_vm3, %v3314_v15  ;;  %v335_v29 = vsel %vm4571_vm4, %v330_v17, %v334_v59  ;;  %v358_v31 = vrot.slane %v356_v22, 5  ;;  %v371_v35 = vshrl.u32 %v4613_v14, 16  ;;  %v340_v36 = vrot.slane %v339_v24, 4  ;;  %v4672_v24 = vld [vmem:[%s4524_s28 + $0x4c] sm:$0xf] }
  0x24   : > { %3886 = vmatpush3.bf16.msra.mxu1 %v4527_v6  ;;  %v362_v37 = vrot.slane %v360_v26, 4  ;;  %v368_v40 = vrot.slane %v366_v27, 5  ;;  %v374_v41 = vshll.u32 %v4613_v14, 16  ;;  %v353_v42 = vor.u32 %v352_v30, %v349_v25 }
  0x25   : > { %v373_v43 = vrot.slane %v371_v35, 4  ;;  %v380_v44 = vshll.u32 %v4625_v28, 16  ;;  %v384_v47 = vshrl.u32 %v4625_v28, 16  ;;  %4417 = vmatprep.subr.msk.bf16.mxu1 %vm757_vm0, %v4620_v23  ;;  %v345_v49 = vsel %vm4571_vm4, %v340_v36, %v344_v12 }
  0x26   : > { %v363_v6 = vor.u32 %v362_v37, %v358_v31  ;;  %v376_v50 = vrot.slane %v374_v41, 5  ;;  %v390_v51 = vshll.u32 %v4632_v32, 16  ;;  %v4650_v53 = vcombine.low %v335_v29, %v345_v49 }
  0x27   : > { %v354_v54 = vrot.slane %v353_v42, 4  ;;  %v382_v55 = vrot.slane %v380_v44, 5  ;;  %v386_v56 = vrot.slane %v384_v47, 4  ;;  %v395_v61 = vshrl.u32 %v4640_v48, 16  ;;  %v4694_v42 = vld [vmem:[%s4524_s28 + $0x54] sm:$0xf] }
  0x28   : > { %5536 = vst [vmem:[#allocation3_spill] sm:$0xff] %v4650_v53  ;;  %v364_v58 = vrot.slane %v363_v6, 4  ;;  %v377_v59 = vor.u32 %v376_v50, %v373_v43  ;;  %v392_v60 = vrot.slane %v390_v51, 5  ;;  %3990 = vmatmul.mubr.msk.bf16.vlgmr.msra.gmra.mrb[0].mxu0 %vm708_vm3, %v4650_v53  ;;  %3857 = vmatprep.mubr.msk.bf16.mxu1 %vm708_vm3, %v4650_v53  ;;  %v398_v11 = vshll.u32 %v4640_v48, 16  ;;  %5538 = vst [vmem:[#allocation5_spill] sm:$0xff] %v4694_v42 }
  0x29   : > { %v359_v63 = vsel %vm4571_vm4, %v354_v54, %v358_v31  ;;  %v387_v0 = vor.u32 %v386_v56, %v382_v55  ;;  %v404_v12 = vshll.u32 %v4648_v52, 16  ;;  %4022 = vmatpush3.bf16.msra.mxu0 %v4530_v7  ;;  %v397_v21 = vrot.slane %v395_v61, 4  ;;  %v4699_v6 = vld [vmem:[%s4524_s28 + $0x58] sm:$0xf] }
  0x2a   : > { %v369_v15 = vsel %vm4571_vm4, %v364_v58, %v368_v40  ;;  %v378_v17 = vrot.slane %v377_v59, 4  ;;  %v408_v22 = vshrl.u32 %v4648_v52, 16  ;;  %v400_v27 = vrot.slane %v398_v11, 5  ;;  %4422 = vmatprep.subr.msk.bf16.mxu0 %vm757_vm0, %v4535_v8  ;;  %v4689_v8 = vld [vmem:[%s4524_s28 + $0x50] sm:$0x1] }
  0x2b   : > { %v4674_v25 = vcombine.low %v359_v63, %v369_v15  ;;  %v388_v26 = vrot.slane %v387_v0, 4  ;;  %v406_v29 = vrot.slane %v404_v12, 5  ;;  %v414_v31 = vshll.u32 %v4660_v5, 16  ;;  %v4712_v11 = vld [vmem:[%s4524_s28 + $0x5c] sm:$0x1] }
  0x2c   : > { %v383_v7 = vsel %vm4571_vm4, %v378_v17, %v382_v55  ;;  %v410_v30 = vrot.slane %v408_v22, 4  ;;  %v419_v35 = vshrl.u32 %v4665_v13, 16  ;;  %v401_v37 = vor.u32 %v400_v27, %v397_v21  ;;  %v4716_v15 = vld [vmem:[%s4524_s28 + $0x60] sm:$0xf]  ;;  %v4721_v27 = vld [vmem:[%s4524_s28 + $0x64] sm:$0xf] }
  0x2d   : > { %5537 = vst [vmem:[#allocation4_spill] sm:$0xff] %v4674_v25  ;;  %3993 = vmatprep.mubr.msk.bf16.mxu0 %vm708_vm3, %v4674_v25  ;;  %3858 = vmatmul.mubr.msk.bf16.gmra.mrb[4].mxu1 %vm708_vm3, %v4674_v25  ;;  %v393_v36 = vsel %vm4571_vm4, %v388_v26, %v392_v60  ;;  %v422_v40 = vshll.u32 %v4665_v13, 16  ;;  %v428_v41 = vshll.u32 %v4672_v24, 16  ;;  %v416_v47 = vrot.slane %v414_v31, 5  ;;  %v4933_v25 = vld [vmem:[%s4524_s28 + $0xa8] sm:$0xf] }
  0x2e   : > { %v4696_v43 = vcombine.low %v383_v7, %v393_v36  ;;  %v411_v44 = vor.u32 %v410_v30, %v406_v29  ;;  %v421_v49 = vrot.slane %v419_v35, 4  ;;  %v402_v50 = vrot.slane %v401_v37, 4 }
  0x2f   : > { %v424_v51 = vrot.slane %v422_v40, 5  ;;  %v430_v54 = vrot.slane %v428_v41, 5  ;;  %v432_v55 = vshrl.u32 %v4672_v24, 16  ;;  %v438_v58 = vshll.u32 %v4689_v8, 16 }
  0x30   : > { %5539 = vst [vmem:[#allocation6_spill] sm:$0xff] %v4696_v43  ;;  %3861 = vmatprep.mubr.msk.bf16.mxu1 %vm708_vm3, %v4696_v43  ;;  %v412_v56 = vrot.slane %v411_v44, 4  ;;  %v443_v59 = vshrl.u32 %v4694_v42, 16  ;;  %v446_v60 = vshll.u32 %v4694_v42, 16  ;;  %3994 = vmatmul.mubr.msk.bf16.gmra.mrb[4].mxu0 %vm708_vm3, %v4696_v43  ;;  %v407_v61 = vsel %vm4571_vm4, %v402_v50, %v406_v29 }
  0x31   : > { %v425_v63 = vor.u32 %v424_v51, %v421_v49  ;;  %v434_v0 = vrot.slane %v432_v55, 4  ;;  %v452_v12 = vshll.u32 %v4699_v6, 16  ;;  %v440_v21 = vrot.slane %v438_v58, 5 }
  0x32   : > { %v417_v17 = vsel %vm4571_vm4, %v412_v56, %v416_v47  ;;  %v445_v22 = vrot.slane %v443_v59, 4  ;;  %v448_v26 = vrot.slane %v446_v60, 5  ;;  %v456_v36 = vshrl.u32 %v4699_v6, 16  ;;  %v4735_v47 = vld [vmem:[%s4524_s28 + $0x68] sm:$0x1] }
  0x33   : > { %v4723_v7 = vcombine.low %v407_v61, %v417_v17  ;;  %v426_v29 = vrot.slane %v425_v63, 4  ;;  %v435_v30 = vor.u32 %v434_v0, %v430_v54  ;;  %v454_v31 = vrot.slane %v452_v12, 5 }
  0x34   : > { %v449_v35 = vor.u32 %v448_v26, %v445_v22  ;;  %v462_v37 = vshll.u32 %v4712_v11, 16  ;;  %v467_v40 = vshrl.u32 %v4716_v15, 16  ;;  %v470_v49 = vshll.u32 %v4716_v15, 16 }
  0x35   : > { %5540 = vst [vmem:[#allocation7_spill] sm:$0xff] %v4723_v7  ;;  %3997 = vmatprep.mubr.msk.bf16.mxu0 %vm708_vm3, %v4723_v7  ;;  %3862 = vmatmul.mubr.msk.bf16.gmra.mrb[8].mxu1 %vm708_vm3, %v4723_v7  ;;  %v431_v41 = vsel %vm4571_vm4, %v426_v29, %v430_v54  ;;  %v436_v44 = vrot.slane %v435_v30, 4  ;;  %v476_v50 = vshll.u32 %v4721_v27, 16  ;;  %v458_v55 = vrot.slane %v456_v36, 4  ;;  %v4743_v54 = vld [vmem:[%s4524_s28 + $0x6c] sm:$0xf] }
  0x36   : > { %v450_v51 = vrot.slane %v449_v35, 4  ;;  %v464_v56 = vrot.slane %v462_v37, 5  ;;  %v469_v58 = vrot.slane %v467_v40, 4  ;;  %v472_v60 = vrot.slane %v470_v49, 5  ;;  %v4759_v36 = vld [vmem:[%s4524_s28 + $0x70] sm:$0xf] }
  0x37   : > { %v441_v59 = vsel %vm4571_vm4, %v436_v44, %v440_v21  ;;  %v478_v61 = vrot.slane %v476_v50, 5  ;;  %v480_v63 = vshrl.u32 %v4721_v27, 16  ;;  %v459_v17 = vor.u32 %v458_v55, %v454_v31  ;;  %v4910_v7 = vld [vmem:[%s4524_s28 + $0xa0] sm:$0xf] }
  0x38   : > { %v4745_v0 = vcombine.low %v431_v41, %v441_v59  ;;  %v455_v12 = vsel %vm4571_vm4, %v450_v51, %v454_v31  ;;  %v486_v22 = vshll.u32 %v4735_v47, 16  ;;  %v473_v21 = vor.u32 %v472_v60, %v469_v58  ;;  %v4772_v51 = vld [vmem:[%s4524_s28 + $0x74] sm:$0x1] }
  0x39   : > { %v482_v29 = vrot.slane %v480_v63, 4  ;;  %v3378_v30 = vrot.slane %v4549_v16, 9  ;;  %v1242_v35 = vrot.slane %v4552_v18, 5  ;;  %v460_v31 = vrot.slane %v459_v17, 4 }
  0x3a   : > { %5541 = vst [vmem:[#allocation8_spill] sm:$0xff] %v4745_v0  ;;  %3998 = vmatmul.mubr.msk.bf16.gmra.mrb[8].mxu0 %vm708_vm3, %v4745_v0  ;;  %3865 = vmatprep.mubr.msk.bf16.mxu1 %vm708_vm3, %v4745_v0  ;;  %v488_v37 = vrot.slane %v486_v22, 5  ;;  %v491_v40 = vshrl.u32 %v4743_v54, 16  ;;  %v494_v41 = vshll.u32 %v4743_v54, 16  ;;  %v474_v44 = vrot.slane %v473_v21, 4 }
  0x3b   : > { %v483_v49 = vor.u32 %v482_v29, %v478_v61  ;;  %v1243_v16 = vsel %vm4752_vm7, %v3378_v30, %v1242_v35  ;;  %v1244_v18 = vrot.slane %v1242_v35, 4  ;;  %v465_v50 = vsel %vm4571_vm4, %v460_v31, %v464_v56  ;;  %v4784_v56 = vld [vmem:[%s4524_s28 + $0x78] sm:$0xf]  ;;  %v4800_v31 = vld [vmem:[%s4524_s28 + $0x7c] sm:$0xf] }
  0x3c   : > { %v493_v55 = vrot.slane %v491_v40, 4  ;;  %v496_v58 = vrot.slane %v494_v41, 5  ;;  %v500_v59 = vshll.u32 %v4759_v36, 16  ;;  %v4775_v60 = vcombine.low %v455_v12, %v465_v50 }
  0x3d   : > { %v479_v63 = vsel %vm4571_vm4, %v474_v44, %v478_v61  ;;  %v484_v17 = vrot.slane %v483_v49, 4  ;;  %v1246_v22 = vsel %vm4752_vm7, %v1244_v18, %v1245_v45  ;;  %v504_v35 = vshrl.u32 %v4759_v36, 16  ;;  %v4805_v49 = vld [vmem:[%s4524_s28 + $0x80] sm:$0x1] }
  0x3e   : > { %5544 = vst [vmem:[#allocation9_spill] sm:$0xff] %v4775_v60  ;;  %v4786_v21 = vcombine.low %v1243_v16, %v1246_v22  ;;  %v497_v29 = vor.u32 %v496_v58, %v493_v55  ;;  %v502_v30 = vrot.slane %v500_v59, 5  ;;  %4001 = vmatprep.mubr.msk.bf16.mxu0 %vm708_vm3, %v4775_v60  ;;  %3866 = vmatmul.mubr.msk.bf16.gmra.mrb[12].mxu1 %vm708_vm3, %v4775_v60  ;;  %v510_v45 = vshll.u32 %v4772_v51, 16  ;;  %v4903_v60 = vld [vmem:[%s4524_s28 + $0x9c] sm:$0xf] }
  0x3f   : > { %v489_v19 = vsel %vm4571_vm4, %v484_v17, %v488_v37  ;;  %v3379_v61 = vrot.slane %v4567_v33, 9  ;;  %v1251_v12 = vrot.slane %v1249_v1, 4  ;;  %v506_v44 = vrot.slane %v504_v35, 4 }
  0x40   : > { %5545 = vst [vmem:[#allocation10_spill] sm:$0xff] %v4786_v21  ;;  %v4802_v40 = vcombine.low %v479_v63, %v489_v19  ;;  %v498_v41 = vrot.slane %v497_v29, 4  ;;  %v515_v16 = vshrl.u32 %v4784_v56, 16  ;;  %v512_v18 = vrot.slane %v510_v45, 5  ;;  %v4831_v29 = vld [vmem:[%s4524_s28 + $0x84] sm:$0xf] }
  0x41   : > { %v1250_v37 = vsel %vm4752_vm7, %v3379_v61, %v1249_v1  ;;  %v1253_v50 = vsel %vm4752_vm7, %v1251_v12, %v1252_v2  ;;  %v518_v55 = vshll.u32 %v4784_v56, 16  ;;  %v507_v59 = vor.u32 %v506_v44, %v502_v30 }
  0x42   : > { %5546 = vst [vmem:[#allocation11_spill] sm:$0xff] %v4802_v40  ;;  %4002 = vmatmul.mubr.msk.bf16.gmra.mrb[12].mxu0 %vm708_vm3, %v4802_v40  ;;  %3869 = vmatprep.mubr.msk.bf16.mxu1 %vm708_vm3, %v4802_v40  ;;  %v503_v58 = vsel %vm4571_vm4, %v498_v41, %v502_v30  ;;  %v4823_v63 = vcombine.low %v1250_v37, %v1253_v50  ;;  %v517_v1 = vrot.slane %v515_v16, 4  ;;  %v524_v2 = vshll.u32 %v4800_v31, 16  ;;  %v4837_v16 = vld [vmem:[%s4524_s28 + $0x88] sm:$0xf] }
  0x43   : > { %4023 = vmatprep.mubr.msk.bf16.mxu0 %vm708_vm3, %v4786_v21  ;;  %v520_v46 = vrot.slane %v518_v55, 5  ;;  %v528_v17 = vshrl.u32 %v4800_v31, 16  ;;  %v534_v22 = vshll.u32 %v4805_v49, 16  ;;  %v508_v35 = vrot.slane %v507_v59, 4 }
  0x44   : > { %5547 = vst [vmem:[#allocation12_spill] sm:$0xff] %v4823_v63  ;;  %v3380_v30 = vrot.slane %v4594_v57, 9  ;;  %v1256_v19 = vrot.slane %v4599_v62, 5  ;;  %v1259_v45 = vrot.slane %v4607_v4, 5  ;;  %v526_v12 = vrot.slane %v524_v2, 5 }
  0x45   : > { %v521_v61 = vor.u32 %v520_v46, %v517_v1  ;;  %v530_v41 = vrot.slane %v528_v17, 4  ;;  %v536_v44 = vrot.slane %v534_v22, 5  ;;  %v513_v37 = vsel %vm4571_vm4, %v508_v35, %v512_v18  ;;  %v4847_v1 = vld [vmem:[%s4524_s28 + $0x8c] sm:$0x1] }
  0x46   : > { %v1257_v50 = vsel %vm4752_vm7, %v3380_v30, %v1256_v19  ;;  %v1258_v55 = vrot.slane %v1256_v19, 4  ;;  %v539_v59 = vshrl.u32 %v4831_v29, 16  ;;  %v4844_v3 = vcombine.low %v503_v58, %v513_v37 }
  0x47   : > { %v522_v40 = vrot.slane %v521_v61, 4  ;;  %v531_v4 = vor.u32 %v530_v41, %v526_v12  ;;  %v542_v46 = vshll.u32 %v4831_v29, 16  ;;  %v548_v18 = vshll.u32 %v4837_v16, 16  ;;  %v4861_v61 = vld [vmem:[%s4524_s28 + $0x90] sm:$0xf] }
  0x48   : > { %5548 = vst [vmem:[#allocation13_spill] sm:$0xff] %v4844_v3  ;;  %v1260_v2 = vsel %vm4752_vm7, %v1258_v55, %v1259_v45  ;;  %v541_v17 = vrot.slane %v539_v59, 4  ;;  %v552_v22 = vshrl.u32 %v4837_v16, 16  ;;  %3870 = vmatmul.mubr.msk.bf16.gmra.mrb[16].mxu1 %vm708_vm3, %v4844_v3  ;;  %v4866_v45 = vld [vmem:[%s5498_s1 + $0xe] sm:$0x3]  ;;  %v1263_v59 = vrot.slane %v4625_v28, 5 }
  0x49   : > { %v527_v58 = vsel %vm4571_vm4, %v522_v40, %v526_v12  ;;  %v532_v35 = vrot.slane %v531_v4, 4  ;;  %v4858_v30 = vcombine.low %v1257_v50, %v1260_v2  ;;  %v544_v19 = vrot.slane %v542_v46, 5  ;;  %5550 = vst [vmem:[#allocation15_spill] sm:$0xff] %v4866_v45  ;;  %v4880_v46 = vld [vmem:[%s4524_s28 + $0x94] sm:$0xf] }
  0x4a   : > { %4024 = vmatmul.mubr.msk.bf16.vlgmr.msra.gmra.mrb[0].mxu0 %vm708_vm3, %v4823_v63  ;;  %v550_v41 = vrot.slane %v548_v18, 5  ;;  %v554_v37 = vrot.slane %v552_v22, 4  ;;  %v558_v40 = vshll.u32 %v4847_v1, 16  ;;  %v3381_v12 = vrot.slane %v4613_v14, 9  ;;  %v4885_v3 = vld [vmem:[%s4524_s28 + $0x98] sm:$0x1] }
  0x4b   : > { %5549 = vst [vmem:[#allocation14_spill] sm:$0xff] %v4858_v30  ;;  %4056 = vmatpush3.bf16.msra.mxu0 %v4559_v20  ;;  %v537_v50 = vsel %vm4571_vm4, %v532_v35, %v536_v44  ;;  %4027 = vmatprep.mubr.msk.bf16.mxu0 %vm708_vm3, %v4858_v30  ;;  %v545_v55 = vor.u32 %v544_v19, %v541_v17  ;;  %v1266_v4 = vrot.slane %v4632_v32, 5  ;;  %v563_v20 = vshrl.u32 %v4861_v61, 16 }
  0x4c   : > { %v4882_v2 = vcombine.low %v527_v58, %v537_v50  ;;  %v555_v18 = vor.u32 %v554_v37, %v550_v41  ;;  %v560_v22 = vrot.slane %v558_v40, 5  ;;  %4423 = vmatprep.subr.msk.bf16.mxu0 %vm757_vm0, %v4866_v45  ;;  %v1264_v17 = vsel %vm4752_vm7, %v3381_v12, %v1263_v59 }
  0x4d   : > { %v546_v44 = vrot.slane %v545_v55, 4  ;;  %v1265_v35 = vrot.slane %v1263_v59, 4  ;;  %v566_v32 = vshll.u32 %v4861_v61, 16  ;;  %v565_v19 = vrot.slane %v563_v20, 4 }
  0x4e   : > { %5551 = vst [vmem:[#allocation16_spill] sm:$0xff] %v4882_v2  ;;  %3873 = vmatprep.mubr.msk.bf16.mxu1 %vm708_vm3, %v4882_v2  ;;  %v556_v58 = vrot.slane %v555_v18, 4  ;;  %v572_v37 = vshll.u32 %v4880_v46, 16  ;;  %v576_v40 = vshrl.u32 %v4880_v46, 16  ;;  %v582_v59 = vshll.u32 %v4885_v3, 16 }
  0x4f   : > { %v551_v50 = vsel %vm4571_vm4, %v546_v44, %v550_v41  ;;  %v1267_v55 = vsel %vm4752_vm7, %v1265_v35, %v1266_v4  ;;  %v568_v12 = vrot.slane %v566_v32, 5  ;;  %v3382_v4 = vrot.slane %v4640_v48, 9 }
  0x50   : > { %v561_v2 = vsel %vm4571_vm4, %v556_v58, %v560_v22  ;;  %v4907_v18 = vcombine.low %v1264_v17, %v1267_v55  ;;  %v574_v20 = vrot.slane %v572_v37, 5  ;;  %v578_v0 = vrot.slane %v576_v40, 4  ;;  %v4923_v58 = vld [vmem:[%s4524_s28 + $0xa4] sm:$0x1] }
  0x51   : > { %v4912_v43 = vcombine.low %v551_v50, %v561_v2  ;;  %v569_v41 = vor.u32 %v568_v12, %v565_v19  ;;  %v584_v44 = vrot.slane %v582_v59, 5  ;;  %v1270_v32 = vrot.slane %v4648_v52, 5 }
  0x52   : > { %5552 = vst [vmem:[#allocation17_spill] sm:$0xff] %v4907_v18  ;;  %4028 = vmatmul.mubr.msk.bf16.gmra.mrb[4].mxu0 %vm708_vm3, %v4907_v18  ;;  %v579_v35 = vor.u32 %v578_v0, %v574_v20  ;;  %v1273_v22 = vrot.slane %v4660_v5, 5  ;;  %v587_v17 = vshrl.u32 %v4903_v60, 16  ;;  %v590_v19 = vshll.u32 %v4903_v60, 16 }
  0x53   : > { %5553 = vst [vmem:[#allocation18_spill] sm:$0xff] %v4912_v43  ;;  %3874 = vmatmul.mubr.msk.bf16.gmra.mrb[20].mxu1 %vm708_vm3, %v4912_v43  ;;  %v570_v2 = vrot.slane %v569_v41, 4  ;;  %v596_v37 = vshll.u32 %v4910_v7, 16  ;;  %v600_v0 = vshrl.u32 %v4910_v7, 16  ;;  %v1271_v5 = vsel %vm4752_vm7, %v3382_v4, %v1270_v32 }
  0x54   : > { %v580_v40 = vrot.slane %v579_v35, 4  ;;  %v1272_v50 = vrot.slane %v1270_v32, 4  ;;  %v589_v55 = vrot.slane %v587_v17, 4  ;;  %v592_v59 = vrot.slane %v590_v19, 5  ;;  %v4942_v32 = vld [vmem:[%s4524_s28 + $0xac] sm:$0xf] }
  0x55   : > { %v575_v12 = vsel %vm4571_vm4, %v570_v2, %v574_v20  ;;  %v598_v41 = vrot.slane %v596_v37, 5  ;;  %v602_v43 = vrot.slane %v600_v0, 4  ;;  %v606_v35 = vshll.u32 %v4923_v58, 16 }
  0x56   : > { %v585_v53 = vsel %vm4571_vm4, %v580_v40, %v584_v44  ;;  %v1274_v18 = vsel %vm4752_vm7, %v1272_v50, %v1273_v22  ;;  %v3383_v4 = vrot.slane %v4665_v13, 9  ;;  %v593_v2 = vor.u32 %v592_v59, %v589_v55 }
  0x57   : > { %v4944_v17 = vcombine.low %v575_v12, %v585_v53  ;;  %v4946_v20 = vcombine.low %v1271_v5, %v1274_v18  ;;  %v603_v19 = vor.u32 %v602_v43, %v598_v41  ;;  %v608_v37 = vrot.slane %v606_v35, 5  ;;  %v4956_v18 = vld [vmem:[%s4524_s28 + $0xb0] sm:$0x1] }
  0x58   : > { %v1277_v0 = vrot.slane %v4672_v24, 5  ;;  %v1280_v44 = vrot.slane %v4689_v8, 5  ;;  %v611_v22 = vshrl.u32 %v4933_v25, 16  ;;  %v594_v53 = vrot.slane %v593_v2, 4 }
  0x59   : > { %5554 = vst [vmem:[#allocation19_spill] sm:$0xff] %v4944_v17  ;;  %5555 = vst [vmem:[#allocation20_spill] sm:$0xff] %v4946_v20  ;;  %3877 = vmatprep.mubr.msk.bf16.mxu1 %vm708_vm3, %v4944_v17  ;;  %4031 = vmatprep.mubr.msk.bf16.mxu0 %vm708_vm3, %v4946_v20  ;;  %v604_v40 = vrot.slane %v603_v19, 4  ;;  %v614_v43 = vshll.u32 %v4933_v25, 16  ;;  %v620_v5 = vshll.u32 %v4942_v32, 16  ;;  %v624_v12 = vshrl.u32 %v4942_v32, 16 }
  0x5a   : > { %v1278_v8 = vsel %vm4752_vm7, %v3383_v4, %v1277_v0  ;;  %v1279_v50 = vrot.slane %v1277_v0, 4  ;;  %v613_v55 = vrot.slane %v611_v22, 4  ;;  %v599_v59 = vsel %vm4571_vm4, %v594_v53, %v598_v41  ;;  %v4968_v17 = vld [vmem:[%s4524_s28 + $0xb4] sm:$0xf]  ;;  %v4980_v53 = vld [vmem:[%s4524_s28 + $0xb8] sm:$0xf] }
  0x5b   : > { %v609_v35 = vsel %vm4571_vm4, %v604_v40, %v608_v37  ;;  %v616_v2 = vrot.slane %v614_v43, 5  ;;  %v622_v19 = vrot.slane %v620_v5, 5  ;;  %v626_v0 = vrot.slane %v624_v12, 4 }
  0x5c   : > { %v4970_v20 = vcombine.low %v599_v59, %v609_v35  ;;  %v1281_v4 = vsel %vm4752_vm7, %v1279_v50, %v1280_v44  ;;  %v630_v22 = vshll.u32 %v4956_v18, 16  ;;  %v3384_v41 = vrot.slane %v4694_v42, 9  ;;  %v4986_v44 = vld [vmem:[%s4524_s28 + $0xbc] sm:$0x1] }
  0x5d   : > { %v4975_v30 = vcombine.low %v1278_v8, %v1281_v4  ;;  %v617_v63 = vor.u32 %v616_v2, %v613_v55  ;;  %v1284_v37 = vrot.slane %v4699_v6, 5  ;;  %v627_v40 = vor.u32 %v626_v0, %v622_v19 }
  0x5e   : > { %5556 = vst [vmem:[#allocation21_spill] sm:$0xff] %v4970_v20  ;;  %3878 = vmatmul.mubr.msk.bf16.gmra.mrb[24].mxu1 %vm708_vm3, %v4970_v20  ;;  %v632_v43 = vrot.slane %v630_v22, 5  ;;  %v1287_v5 = vrot.slane %v4712_v11, 5  ;;  %v635_v50 = vshrl.u32 %v4968_v17, 16  ;;  %v638_v59 = vshll.u32 %v4968_v17, 16 }
  0x5f   : > { %5557 = vst [vmem:[#allocation22_spill] sm:$0xff] %v4975_v30  ;;  %4032 = vmatmul.mubr.msk.bf16.gmra.mrb[8].mxu0 %vm708_vm3, %v4975_v30  ;;  %v618_v8 = vrot.slane %v617_v63, 4  ;;  %v1285_v55 = vsel %vm4752_vm7, %v3384_v41, %v1284_v37  ;;  %v1286_v12 = vrot.slane %v1284_v37, 4  ;;  %v628_v35 = vrot.slane %v627_v40, 4 }
  0x60   : > { %v637_v2 = vrot.slane %v635_v50, 4  ;;  %v644_v4 = vshll.u32 %v4980_v53, 16  ;;  %v648_v11 = vshrl.u32 %v4980_v53, 16  ;;  %v640_v20 = vrot.slane %v638_v59, 5 }
  0x61   : > { %v623_v0 = vsel %vm4571_vm4, %v618_v8, %v622_v19  ;;  %v1288_v22 = vsel %vm4752_vm7, %v1286_v12, %v1287_v5  ;;  %v654_v63 = vshll.u32 %v4986_v44, 16  ;;  %v633_v41 = vsel %vm4571_vm4, %v628_v35, %v632_v43 }
  0x62   : > { %v5003_v37 = vcombine.low %v1285_v55, %v1288_v22  ;;  %v646_v40 = vrot.slane %v644_v4, 5  ;;  %v650_v50 = vrot.slane %v648_v11, 4  ;;  %v5005_v30 = vcombine.low %v623_v0, %v633_v41 }
  0x63   : > { %v641_v21 = vor.u32 %v640_v20, %v637_v2  ;;  %v656_v45 = vrot.slane %v654_v63, 5  ;;  %v3385_v42 = vrot.slane %v4716_v15, 9  ;;  %v1291_v5 = vrot.slane %v4721_v27, 5 }
  0x64   : > { %4035 = vmatprep.mubr.msk.bf16.mxu0 %vm708_vm3, %v5003_v37  ;;  %v651_v19 = vor.u32 %v650_v50, %v646_v40  ;;  %v1294_v8 = vrot.slane %v4735_v47, 5  ;;  %v3386_v43 = vrot.slane %v4743_v54, 9  ;;  %3881 = vmatprep.mubr.msk.bf16.mxu1 %vm708_vm3, %v5005_v30  ;;  %v3345_v20 = vcombine.low %v4538_v9, %v4541_v10 }
  0x65   : > { %v642_v55 = vrot.slane %v641_v21, 4  ;;  %v1298_v12 = vrot.slane %v4759_v36, 5  ;;  %v1301_v59 = vrot.slane %v4772_v51, 5  ;;  %v1292_v2 = vsel %vm4752_vm7, %v3385_v42, %v1291_v5 }
  0x66   : > { %v652_v35 = vrot.slane %v651_v19, 4  ;;  %v1293_v4 = vrot.slane %v1291_v5, 4  ;;  %v1305_v47 = vrot.slane %v4800_v31, 5  ;;  %v3387_v9 = vrot.slane %v4784_v56, 9 }
  0x67   : > { %v647_v11 = vsel %vm4571_vm4, %v642_v55, %v646_v40  ;;  %v1299_v21 = vsel %vm4752_vm7, %v3386_v43, %v1298_v12  ;;  %v1300_v0 = vrot.slane %v1298_v12, 4  ;;  %v1308_v42 = vrot.slane %v4805_v49, 5 }
  0x68   : > { %v657_v10 = vsel %vm4571_vm4, %v652_v35, %v656_v45  ;;  %v1295_v51 = vsel %vm4752_vm7, %v1293_v4, %v1294_v8  ;;  %v1307_v22 = vrot.slane %v1305_v47, 4  ;;  %v3388_v19 = vrot.slane %v4831_v29, 9 }
  0x69   : > { %v5032_v63 = vcombine.low %v647_v11, %v657_v10  ;;  %v5034_v41 = vcombine.low %v1292_v2, %v1295_v51  ;;  %v1302_v40 = vsel %vm4752_vm7, %v1300_v0, %v1301_v59  ;;  %v1312_v5 = vrot.slane %v4837_v16, 5 }
  0x6a   : > { %v5038_v50 = vcombine.low %v1299_v21, %v1302_v40  ;;  %v1315_v49 = vrot.slane %v4847_v1, 5  ;;  %v1306_v45 = vsel %vm4752_vm7, %v3387_v9, %v1305_v47  ;;  %v1309_v8 = vsel %vm4752_vm7, %v1307_v22, %v1308_v42 }
  0x6b   : > { %3882 = vmatmul.mubr.msk.bf16.gmra.mrb[28].mxu1 %vm708_vm3, %v5032_v63  ;;  %4036 = vmatmul.mubr.msk.bf16.gmra.mrb[12].mxu0 %vm708_vm3, %v5034_v41  ;;  %v1314_v43 = vrot.slane %v1312_v5, 4  ;;  %v1319_v55 = vrot.slane %v4880_v46, 5  ;;  %v1326_v12 = vrot.slane %v4910_v7, 5  ;;  %v1313_v59 = vsel %vm4752_vm7, %v3388_v19, %v1312_v5 }
  0x6c   : > { %3887 = vmatprep.mubr.msk.bf16.mxu1 %vm708_vm3, %v3345_v20  ;;  %4039 = vmatprep.mubr.msk.bf16.mxu0 %vm708_vm3, %v5038_v50  ;;  %v5060_v20 = vcombine.low %v1306_v45, %v1309_v8  ;;  %v3389_v35 = vrot.slane %v4861_v61, 9  ;;  %v1322_v4 = vrot.slane %v4885_v3, 5  ;;  %v5066_v47 = vcombine.low %v4567_v33, %v4580_v39  ;;  %v5078_v3 = vld [vmem:[%s5498_s1 + $0x6] sm:$0x3] }
  0x6d   : > { %v1316_v1 = vsel %vm4752_vm7, %v1314_v43, %v1315_v49  ;;  %v1321_v2 = vrot.slane %v1319_v55, 4  ;;  %v3390_v11 = vrot.slane %v4903_v60, 9  ;;  %v1444_v21 = vsel %vm757_vm0, %v4620_v23, 0 }
  0x6e   : > { %v5071_v0 = vcombine.low %v1313_v59, %v1316_v1  ;;  %v1328_v9 = vrot.slane %v1326_v12, 4  ;;  %v1329_v10 = vrot.slane %v4923_v58, 5  ;;  %v1333_v51 = vrot.slane %v4942_v32, 5 }
  0x6f   : > { %v1320_v33 = vsel %vm4752_vm7, %v3389_v35, %v1319_v55  ;;  %v1323_v39 = vsel %vm4752_vm7, %v1321_v2, %v1322_v4  ;;  %v5092_v23 = vcombine.low %v4594_v57, %v4599_v62  ;;  %v1327_v58 = vsel %vm4752_vm7, %v3390_v11, %v1326_v12 }
  0x70   : > { %v5098_v22 = vcombine.low %v4716_v15, %v4721_v27  ;;  %v1330_v42 = vsel %vm4752_vm7, %v1328_v9, %v1329_v10  ;;  %v3391_v40 = vrot.slane %v4933_v25, 9  ;;  %v1340_v19 = vrot.slane %v4980_v53, 5 }
  0x71   : > { %v5108_v57 = vcombine.low %v4743_v54, %v4759_v36  ;;  %v5112_v62 = vcombine.low %v1320_v33, %v1323_v39  ;;  %v1335_v15 = vrot.slane %v1333_v51, 4  ;;  %v1336_v27 = vrot.slane %v4956_v18, 5  ;;  %v266_v18 = vld [vmem:[%s4524_s28 + $0xc8] sm:$0x1] }
  0x72   : > { %v5117_v5 = vcombine.low %v4784_v56, %v4800_v31  ;;  %v5121_v49 = vcombine.low %v4831_v29, %v4837_v16  ;;  %v5125_v54 = vcombine.low %v4861_v61, %v4880_v46  ;;  %v5129_v36 = vcombine.low %v4903_v60, %v4910_v7  ;;  %v5148_v61 = vld [vmem:[%s4524_s28 + $0xc4] sm:$0xf] }
  0x73   : > { %3888 = vmatmul.mubr.msk.bf16.vlgmr.msra.gmra.mrb[0].mxu1 %vm708_vm3, %v4577_v38  ;;  %4040 = vmatmul.mubr.msk.bf16.gmra.mrb[16].mxu0 %vm708_vm3, %v5060_v20  ;;  %v5133_v45 = vcombine.low %v4933_v25, %v4942_v32  ;;  %v5137_v56 = vcombine.low %v4613_v14, %v4625_v28  ;;  %v5139_v31 = vcombine.low %v1327_v58, %v1330_v42  ;;  %v3392_v16 = vrot.slane %v4968_v17, 9  ;;  %v5558_v42 = vld [vmem:[#allocation5_spill] sm:$0xff] }
  0x74   : > { %3920 = vmatpush3.bf16.msra.mxu1 %v1444_v21  ;;  %3891 = vmatprep.mubr.msk.bf16.mxu1 %vm708_vm3, %v5066_v47  ;;  %v5143_v29 = vcombine.low %v4968_v17, %v4980_v53  ;;  %v1342_v7 = vrot.slane %v1340_v19, 4  ;;  %v1343_v60 = vrot.slane %v4986_v44, 5  ;;  %v1334_v14 = vsel %vm4752_vm7, %v3391_v40, %v1333_v51  ;;  %v5168_v17 = vld [vmem:[%s4524_s28 + $0xc0] sm:$0xf] }
  0x75   : > { %4043 = vmatprep.mubr.msk.bf16.mxu0 %vm708_vm3, %v5071_v0  ;;  %4418 = vmatprep.subr.msk.bf16.mxu1 %vm757_vm0, %v5078_v3  ;;  %v1337_v28 = vsel %vm4752_vm7, %v1335_v15, %v1336_v27  ;;  %v2076_v25 = vrot.slane %v5148_v61, 5  ;;  %v1341_v46 = vsel %vm4752_vm7, %v3392_v16, %v1340_v19  ;;  %v5173_v53 = vcombine.low %v4640_v48, %v4648_v52 }
  0x76   : > { %v1344_v32 = vsel %vm4752_vm7, %v1342_v7, %v1343_v60  ;;  %v5175_v44 = vcombine.low %v1334_v14, %v1337_v28  ;;  %v5179_v8 = vcombine.low %v4665_v13, %v4672_v24  ;;  %v1846_v43 = vshrl.u32 %v5168_v17, 16  ;;  %v3518_v60 = vld [vmem:[%s5498_s1 + $0x10] sm:$0x3]  ;;  %v4452_v14 = vld [vmem:[%s4524_s28 + $0x4] sm:$0xf] }
  0x77   : > { %v1849_v55 = vshll.u32 %v5168_v17, 16  ;;  %v1855_v12 = vshll.u32 %v5148_v61, 16  ;;  %v1859_v59 = vshrl.u32 %v5148_v61, 16  ;;  %v5185_v1 = vcombine.low %v1341_v46, %v1344_v32  ;;  %v4454_v32 = vld [vmem:[%s4524_s28] sm:$0xf] }
  0x78   : > { %v3462_v35 = vrot.slane %v5168_v17, 9  ;;  %v2078_v48 = vrot.slane %v2076_v25, 4  ;;  %v2079_v52 = vrot.slane %v266_v18, 5  ;;  %v1848_v2 = vrot.slane %v1846_v43, 4 }
  0x79   : > { %v1851_v4 = vrot.slane %v1849_v55, 5  ;;  %v1857_v11 = vrot.slane %v1855_v12, 5  ;;  %v1861_v21 = vrot.slane %v1859_v59, 4  ;;  %v1865_v9 = vshll.u32 %v266_v18, 16 }
  0x7a   : > { %v2077_v10 = vsel %vm4752_vm7, %v3462_v35, %v2076_v25  ;;  %v2080_v51 = vsel %vm4752_vm7, %v2078_v48, %v2079_v52  ;;  %v5202_v40 = vcombine.low %v5558_v42, %v4699_v6  ;;  %v5559_v6 = vld [vmem:[#allocation15_spill] sm:$0xff]  ;;  %v1235_v28 = vrot.slane %v4452_v14, 5  ;;  %v5560_v48 = vld [vmem:[#allocation10_spill] sm:$0xff]  ;;  %v5561_v52 = vld [vmem:[#allocation12_spill] sm:$0xff] }
  0x7b   : > { %3892 = vmatmul.mubr.msk.bf16.gmra.mrb[4].mxu1 %vm708_vm3, %v5092_v23  ;;  %4044 = vmatmul.mubr.msk.bf16.gmra.mrb[20].mxu0 %vm708_vm3, %v5112_v62  ;;  %v1852_v13 = vor.u32 %v1851_v4, %v1848_v2  ;;  %v1862_v24 = vor.u32 %v1861_v21, %v1857_v11  ;;  %v1867_v58 = vrot.slane %v1865_v9, 5  ;;  %v5204_v19 = vcombine.low %v2077_v10, %v2080_v51  ;;  %v4453_v25 = vld [vmem:[%s4524_s28 + $0x8] sm:$0x1]  ;;  %v5563_v4 = vld [vmem:[#allocation17_spill] sm:$0xff]  ;;  %v5564_v21 = vld [vmem:[#allocation20_spill] sm:$0xff] }
  0x7c   : > { %3895 = vmatprep.mubr.msk.bf16.mxu1 %vm708_vm3, %v5137_v56  ;;  %4047 = vmatprep.mubr.msk.bf16.mxu0 %vm708_vm3, %v5139_v31  ;;  %v2524_v7 = vsel %vm757_vm0, %v5559_v6, 0  ;;  %v1238_v46 = vrot.slane %v4453_v25, 5  ;;  %v3377_v18 = vrot.slane %v4454_v32, 9  ;;  %v1237_v43 = vrot.slane %v1235_v28, 4  ;;  %v4455_v2 = vld [vmem:[%s5498_s1 + $0x8] sm:$0x3] }
  0x7d   : > { %v1853_v33 = vrot.slane %v1852_v13, 4  ;;  %v1863_v39 = vrot.slane %v1862_v24, 4  ;;  %v1650_v35 = vsel %vm757_vm0, %v5078_v3, 0  ;;  %v5562_v3 = vld [vmem:[#allocation14_spill] sm:$0xff]  ;;  %v5299_v24 = vld [vmem:[%s4524_s28 + $0xcc] sm:$0xf] }
  0x7e   : > { %v1236_v55 = vsel %vm4752_vm7, %v3377_v18, %v1235_v28  ;;  %v1239_v12 = vsel %vm4752_vm7, %v1237_v43, %v1238_v46  ;;  %v5565_v13 = vld [vmem:[#allocation22_spill] sm:$0xff]  ;;  %v5302_v9 = vld [vmem:[%s4524_s28 + $0xd0] sm:$0xf]  ;;  %v2736_v10 = vsel %vm757_vm0, %v3518_v60, 0  ;;  %v5571_v42 = vld [vmem:[#allocation9_spill] sm:$0xff]  ;;  %v2495_v14 = vshll.u32 %v5299_v24, 16 }
  0x7f   : > { %v1858_v15 = vsel %vm4571_vm4, %v1853_v33, %v1857_v11  ;;  %v1868_v27 = vsel %vm4571_vm4, %v1863_v39, %v1867_v58  ;;  %v3394_v59 = vcombine.low %v1236_v55, %v1239_v12  ;;  %v5288_v11 = vcombine.low %v5168_v17, %v5148_v61  ;;  %v5566_v17 = vld [vmem:[#allocation3_spill] sm:$0xff]  ;;  %v5567_v51 = vld [vmem:[#allocation4_spill] sm:$0xff]  ;;  %v5568_v33 = vld [vmem:[#allocation6_spill] sm:$0xff] }
  0x80   : > { %v5210_v16 = vcombine.low %v1858_v15, %v1868_v27  ;;  %v3482_v61 = vcombine.low %v5299_v24, %v5302_v9  ;;  %v5569_v39 = vld [vmem:[#allocation7_spill] sm:$0xff]  ;;  %v5570_v58 = vld [vmem:[#allocation8_spill] sm:$0xff]  ;;  %v5573_v27 = vld [vmem:[#allocation13_spill] sm:$0xff]  ;;  %v2505_v28 = vshrl.u32 %v5302_v9, 16  ;;  %v2497_v32 = vrot.slane %v2495_v14, 5 }
  0x81   : > { %v5572_v15 = vld [vmem:[#allocation11_spill] sm:$0xff]  ;;  %v5574_v6 = vld [vmem:[#allocation16_spill] sm:$0xff]  ;;  %v5576_v25 = vld [vmem:[#allocation2_spill] sm:$0xff]  ;;  %v2722_v34 = vrot.slane %v5302_v9, 5 }
  0x82   : > { %v5577_v46 = vld [vmem:[#allocation19_spill] sm:$0xff]  ;;  %v2507_v43 = vrot.slane %v2505_v28, 4  ;;  %v269_v55 = vld [vmem:[%s4524_s28 + $0xd4] sm:$0x1]  ;;  %v5578_v12 = vld [vmem:[#allocation21_spill] sm:$0xff] }
  0x83   : > { %3896 = vmatmul.mubr.msk.bf16.gmra.mrb[8].mxu1 %vm708_vm3, %v5173_v53  ;;  %4048 = vmatmul.mubr.msk.bf16.gmra.mrb[24].mxu0 %vm708_vm3, %v5175_v44 }
  0x84   : > { %3899 = vmatprep.mubr.msk.bf16.mxu1 %vm708_vm3, %v5179_v8  ;;  %4051 = vmatprep.mubr.msk.bf16.mxu0 %vm708_vm3, %v5185_v1 }
  0x8b   : > { %3900 = vmatmul.mubr.msk.bf16.gmra.mrb[12].mxu1 %vm708_vm3, %v5202_v40  ;;  %4052 = vmatmul.mubr.msk.bf16.gmra.mrb[28].mxu0 %vm708_vm3, %v5204_v19 }
  0x8c   : > { %3903 = vmatprep.mubr.msk.bf16.mxu1 %vm708_vm3, %v5098_v22  ;;  %4057 = vmatprep.mubr.msk.bf16.mxu0 %vm708_vm3, %v5066_v47 }
  0x93   : > { %3904 = vmatmul.mubr.msk.bf16.gmra.mrb[16].mxu1 %vm708_vm3, %v5108_v57  ;;  %4058 = vmatmul.mubr.msk.bf16.vlgmr.msra.gmra.mrb[0].mxu0 %vm708_vm3, %v5092_v23 }
  0x94   : > { %4090 = vmatpush3.bf16.msra.mxu0 %v2524_v7  ;;  %3907 = vmatprep.mubr.msk.bf16.mxu1 %vm708_vm3, %v5117_v5  ;;  %v5575_v7 = vld [vmem:[#allocation18_spill] sm:$0xff] }
  0x95   : > { %4061 = vmatprep.mubr.msk.bf16.mxu0 %vm708_vm3, %v5137_v56  ;;  %4424 = vmatprep.subr.msk.bf16.mxu0 %vm757_vm0, %v3518_v60  ;;  %v2492_v60 = vshrl.u32 %v5299_v24, 16 }
  0x9b   : > { %3908 = vmatmul.mubr.msk.bf16.gmra.mrb[20].mxu1 %vm708_vm3, %v5121_v49  ;;  %4062 = vmatmul.mubr.msk.bf16.gmra.mrb[4].mxu0 %vm708_vm3, %v5173_v53 }
  0x9c   : > { %3911 = vmatprep.mubr.msk.bf16.mxu1 %vm708_vm3, %v5125_v54  ;;  %4065 = vmatprep.mubr.msk.bf16.mxu0 %vm708_vm3, %v5179_v8 }
  0xa3   : > { %3912 = vmatmul.mubr.msk.bf16.gmra.mrb[24].mxu1 %vm708_vm3, %v5129_v36  ;;  %4066 = vmatmul.mubr.msk.bf16.gmra.mrb[8].mxu0 %vm708_vm3, %v5202_v40 }
  0xa4   : > { %3915 = vmatprep.mubr.msk.bf16.mxu1 %vm708_vm3, %v5133_v45  ;;  %4069 = vmatprep.mubr.msk.bf16.mxu0 %vm708_vm3, %v5098_v22 }
  0xab   : > { %3916 = vmatmul.mubr.msk.bf16.gmra.mrb[28].mxu1 %vm708_vm3, %v5143_v29  ;;  %4070 = vmatmul.mubr.msk.bf16.gmra.mrb[12].mxu0 %vm708_vm3, %v5108_v57 }
  0xac   : > { %3921 = vmatprep.mubr.msk.bf16.mxu1 %vm708_vm3, %v3394_v59  ;;  %4073 = vmatprep.mubr.msk.bf16.mxu0 %vm708_vm3, %v5117_v5 }
  0xb3   : > { %3922 = vmatmul.mubr.msk.bf16.vlgmr.msra.gmra.mrb[0].mxu1 %vm708_vm3, %v5560_v48  ;;  %4074 = vmatmul.mubr.msk.bf16.gmra.mrb[16].mxu0 %vm708_vm3, %v5121_v49 }
  0xb4   : > { %3954 = vmatpush3.bf16.msra.mxu1 %v1650_v35  ;;  %3925 = vmatprep.mubr.msk.bf16.mxu1 %vm708_vm3, %v5561_v52  ;;  %v2511_v35 = vshll.u32 %v269_v55, 16 }
  0xb5   : > { %4077 = vmatprep.mubr.msk.bf16.mxu0 %vm708_vm3, %v5125_v54  ;;  %4420 = vmatprep.subr.msk.bf16.mxu1 %vm757_vm0, %v4455_v2 }
  0xbb   : > { %3926 = vmatmul.mubr.msk.bf16.gmra.mrb[4].mxu1 %vm708_vm3, %v5562_v3  ;;  %4078 = vmatmul.mubr.msk.bf16.gmra.mrb[20].mxu0 %vm708_vm3, %v5129_v36 }
  0xbc   : > { %3929 = vmatprep.mubr.msk.bf16.mxu1 %vm708_vm3, %v5563_v4  ;;  %4081 = vmatprep.mubr.msk.bf16.mxu0 %vm708_vm3, %v5133_v45 }
  0xc3   : > { %3930 = vmatmul.mubr.msk.bf16.gmra.mrb[8].mxu1 %vm708_vm3, %v5564_v21  ;;  %4082 = vmatmul.mubr.msk.bf16.gmra.mrb[24].mxu0 %vm708_vm3, %v5143_v29 }
  0xc4   : > { %3933 = vmatprep.mubr.msk.bf16.mxu1 %vm708_vm3, %v5565_v13  ;;  %4085 = vmatprep.mubr.msk.bf16.mxu0 %vm708_vm3, %v5288_v11 }
  0xcb   : > { %3934 = vmatmul.mubr.msk.bf16.gmra.mrb[12].mxu1 %vm708_vm3, %v5003_v37  ;;  %4086 = vmatmul.mubr.msk.bf16.gmra.mrb[28].mxu0 %vm708_vm3, %v3482_v61  ;;  %v2513_v61 = vrot.slane %v2511_v35, 5 }
  0xcc   : > { %3937 = vmatprep.mubr.msk.bf16.mxu1 %vm708_vm3, %v5034_v41  ;;  %4091 = vmatprep.mubr.msk.bf16.mxu0 %vm708_vm3, %v5566_v17 }
  0xd3   : > { %3938 = vmatmul.mubr.msk.bf16.gmra.mrb[16].mxu1 %vm708_vm3, %v5038_v50  ;;  %4092 = vmatmul.mubr.msk.bf16.vlgmr.msra.gmra.mrb[0].mxu0 %vm708_vm3, %v5567_v51 }
  0xd4   : > { %4124 = vmatpush3.bf16.msra.mxu0 %v2736_v10  ;;  %3941 = vmatprep.mubr.msk.bf16.mxu1 %vm708_vm3, %v5060_v20 }
  0xd5   : > { %4095 = vmatprep.mubr.msk.bf16.mxu0 %vm708_vm3, %v5568_v33 }
  0xdb   : > { %3942 = vmatmul.mubr.msk.bf16.gmra.mrb[20].mxu1 %vm708_vm3, %v5071_v0  ;;  %4096 = vmatmul.mubr.msk.bf16.gmra.mrb[4].mxu0 %vm708_vm3, %v5569_v39 }
  0xdc   : > { %3945 = vmatprep.mubr.msk.bf16.mxu1 %vm708_vm3, %v5112_v62  ;;  %4099 = vmatprep.mubr.msk.bf16.mxu0 %vm708_vm3, %v5570_v58 }
  0xe3   : > { %3946 = vmatmul.mubr.msk.bf16.gmra.mrb[24].mxu1 %vm708_vm3, %v5139_v31  ;;  %4100 = vmatmul.mubr.msk.bf16.gmra.mrb[8].mxu0 %vm708_vm3, %v5571_v42 }
  0xe4   : > { %3949 = vmatprep.mubr.msk.bf16.mxu1 %vm708_vm3, %v5175_v44  ;;  %4103 = vmatprep.mubr.msk.bf16.mxu0 %vm708_vm3, %v5572_v15 }
  0xeb   : > { %3950 = vmatmul.mubr.msk.bf16.gmra.mrb[28].mxu1 %vm708_vm3, %v5185_v1  ;;  %4104 = vmatmul.mubr.msk.bf16.gmra.mrb[12].mxu0 %vm708_vm3, %v5573_v27 }
  0xec   : > { %3955 = vmatprep.mubr.msk.bf16.mxu1 %vm708_vm3, %v4577_v38  ;;  %4107 = vmatprep.mubr.msk.bf16.mxu0 %vm708_vm3, %v5574_v6  ;;  %v2501_v38 = vshll.u32 %v5302_v9, 16 }
  0xee   : > { %v2503_v18 = vrot.slane %v2501_v38, 5 }
  0xf0   : > { %v2508_v59 = vor.u32 %v2507_v43, %v2503_v18 }
  0xf2   : > { %v2509_v2 = vrot.slane %v2508_v59, 4 }
  0xf3   : > { %3956 = vmatmul.mubr.msk.bf16.vlgmr.msra.gmra.mrb[0].mxu1 %vm708_vm3, %v5066_v47  ;;  %4108 = vmatmul.mubr.msk.bf16.gmra.mrb[16].mxu0 %vm708_vm3, %v5575_v7  ;;  %v2494_v47 = vrot.slane %v2492_v60, 4 }
  0xf4   : > { %4158 = vmatpush3.bf16.msra.mxu1 %v5576_v25  ;;  %3959 = vmatprep.mubr.msk.bf16.mxu1 %vm708_vm3, %v5092_v23 }
  0xf5   : > { %4111 = vmatprep.mubr.msk.bf16.mxu0 %vm708_vm3, %v5577_v46  ;;  %v2498_v23 = vor.u32 %v2497_v32, %v2494_v47 }
  0xf7   : > { %v2499_v48 = vrot.slane %v2498_v23, 4 }
  0xfb   : > { %3960 = vmatmul.mubr.msk.bf16.gmra.mrb[4].mxu1 %vm708_vm3, %v5137_v56  ;;  %4112 = vmatmul.mubr.msk.bf16.gmra.mrb[20].mxu0 %vm708_vm3, %v5578_v12  ;;  %v2504_v56 = vsel %vm4571_vm4, %v2499_v48, %v2503_v18 }
  0xfc   : > { %3963 = vmatprep.mubr.msk.bf16.mxu1 %vm708_vm3, %v5173_v53  ;;  %4115 = vmatprep.mubr.msk.bf16.mxu0 %vm708_vm3, %v5005_v30  ;;  %v2514_v53 = vsel %vm4571_vm4, %v2509_v2, %v2513_v61 }
  0xfd   : > { %v3500_v17 = vcombine.low %v2504_v56, %v2514_v53 }
 0x103   : > { %3964 = vmatmul.mubr.msk.bf16.gmra.mrb[8].mxu1 %vm708_vm3, %v5179_v8  ;;  %4116 = vmatmul.mubr.msk.bf16.gmra.mrb[24].mxu0 %vm708_vm3, %v5032_v63 }
 0x104   : > { %3967 = vmatprep.mubr.msk.bf16.mxu1 %vm708_vm3, %v5202_v40  ;;  %4119 = vmatprep.mubr.msk.bf16.mxu0 %vm708_vm3, %v5210_v16 }
 0x10b   : > { %3968 = vmatmul.mubr.msk.bf16.gmra.mrb[12].mxu1 %vm708_vm3, %v5098_v22  ;;  %4120 = vmatmul.mubr.msk.bf16.gmra.mrb[28].mxu0 %vm708_vm3, %v3500_v17 }
 0x10c   : > { %3971 = vmatprep.mubr.msk.bf16.mxu1 %vm708_vm3, %v5108_v57  ;;  %4125 = vmatprep.mubr.msk.bf16.mxu0 %vm708_vm3, %v5561_v52 }
 0x113   : > { %3972 = vmatmul.mubr.msk.bf16.gmra.mrb[16].mxu1 %vm708_vm3, %v5117_v5  ;;  %4126 = vmatmul.mubr.msk.bf16.vlgmr.msra.gmra.mrb[0].mxu0 %vm708_vm3, %v5562_v3 }
 0x114   : > { %3975 = vmatprep.mubr.msk.bf16.mxu1 %vm708_vm3, %v5121_v49  ;;  %4129 = vmatprep.mubr.msk.bf16.mxu0 %vm708_vm3, %v5563_v4 }
 0x11b   : > { %3976 = vmatmul.mubr.msk.bf16.gmra.mrb[20].mxu1 %vm708_vm3, %v5125_v54  ;;  %4130 = vmatmul.mubr.msk.bf16.gmra.mrb[4].mxu0 %vm708_vm3, %v5564_v21 }
 0x11c   : > { %3979 = vmatprep.mubr.msk.bf16.mxu1 %vm708_vm3, %v5129_v36  ;;  %4133 = vmatprep.mubr.msk.bf16.mxu0 %vm708_vm3, %v5565_v13 }
 0x123   : > { %3980 = vmatmul.mubr.msk.bf16.gmra.mrb[24].mxu1 %vm708_vm3, %v5133_v45  ;;  %4134 = vmatmul.mubr.msk.bf16.gmra.mrb[8].mxu0 %vm708_vm3, %v5003_v37  ;;  %v3517_v37 = vrot.slane %v5299_v24, 9 }
 0x124   : > { %3983 = vmatprep.mubr.msk.bf16.mxu1 %vm708_vm3, %v5143_v29  ;;  %4137 = vmatprep.mubr.msk.bf16.mxu0 %vm708_vm3, %v5034_v41  ;;  %v2724_v41 = vrot.slane %v2722_v34, 4 }
 0x12b   : > { %3984 = vmatmul.mubr.msk.bf16.gmra.mrb[28].mxu1 %vm708_vm3, %v5288_v11  ;;  %4138 = vmatmul.mubr.msk.bf16.gmra.mrb[12].mxu0 %vm708_vm3, %v5038_v50  ;;  %v2725_v50 = vrot.slane %v269_v55, 5 }
 0x12c   : > { %4005 = vmatprep.mubr.msk.bf16.mxu1 %vm708_vm3, %v5573_v27  ;;  %4141 = vmatprep.mubr.msk.bf16.mxu0 %vm708_vm3, %v5060_v20  ;;  %v2723_v20 = vsel %vm4752_vm7, %v3517_v37, %v2722_v34 }
 0x133   : > { %4006 = vmatmul.mubr.msk.bf16.vlgmr.msra.gmra.mrb[16].mxu1 %vm708_vm3, %v5574_v6  ;;  %4142 = vmatmul.mubr.msk.bf16.gmra.mrb[16].mxu0 %vm708_vm3, %v5071_v0  ;;  %v2726_v0 = vsel %vm4752_vm7, %v2724_v41, %v2725_v50 }
 0x134   : > { %4009 = vmatprep.mubr.msk.bf16.mxu1 %vm708_vm3, %v5575_v7  ;;  %4145 = vmatprep.mubr.msk.bf16.mxu0 %vm708_vm3, %v5112_v62  ;;  %v3519_v22 = vcombine.low %v2723_v20, %v2726_v0 }
 0x13b   : > { %4010 = vmatmul.mubr.msk.bf16.gmra.mrb[20].mxu1 %vm708_vm3, %v5577_v46  ;;  %4146 = vmatmul.mubr.msk.bf16.gmra.mrb[20].mxu0 %vm708_vm3, %v5139_v31 }
 0x13c   : > { %4013 = vmatprep.mubr.msk.bf16.mxu1 %vm708_vm3, %v5578_v12  ;;  %4149 = vmatprep.mubr.msk.bf16.mxu0 %vm708_vm3, %v5175_v44 }
 0x143   : > { %4014 = vmatmul.mubr.msk.bf16.gmra.mrb[24].mxu1 %vm708_vm3, %v5005_v30  ;;  %4150 = vmatmul.mubr.msk.bf16.gmra.mrb[24].mxu0 %vm708_vm3, %v5185_v1 }
 0x144   : > { %4017 = vmatprep.mubr.msk.bf16.mxu1 %vm708_vm3, %v5032_v63  ;;  %4153 = vmatprep.mubr.msk.bf16.mxu0 %vm708_vm3, %v5204_v19 }
 0x14b   : > { %4018 = vmatmul.mubr.msk.bf16.gmra.mrb[28].mxu1 %vm708_vm3, %v5210_v16  ;;  %4154 = vmatmul.mubr.msk.bf16.gmra.mrb[28].mxu0 %vm708_vm3, %v3519_v22 }
 0x1c6   : > { %v3957_v30 = vpop.f32.mrb[0].mxu1 }
 0x1c7   : > { %v1686_v57 = vpop.f32.mrb[1].mxu1 }
 0x1c8   : > { %v3958_v62 = vpop.f32.mrb[2].mxu1 }
 0x1c9   : > { %v1689_v5 = vpop.f32.mrb[3].mxu1 }
 0x1ce   : > { %v3961_v63 = vpop.f32.mrb[4].mxu1 }
 0x1cf   : > { %v1702_v49 = vpop.f32.mrb[5].mxu1 }
 0x1d0   : > { %v3962_v54 = vpop.f32.mrb[6].mxu1 }
 0x1d1   : > { %v1705_v36 = vpop.f32.mrb[7].mxu1 }
 0x1d6   : > { %v3965_v45 = vpop.f32.mrb[8].mxu1 }
 0x1d7   : > { %v1718_v31 = vpop.f32.mrb[9].mxu1 }
 0x1d8   : > { %v3966_v29 = vpop.f32.mrb[10].mxu1 }
 0x1d9   : > { %v1721_v26 = vpop.f32.mrb[11].mxu1 }
 0x1de   : > { %v5452_v44 = vpop.f32.mrb[12].mxu1 }
 0x1df   : > { %v5454_v8 = vpop.f32.mrb[13].mxu1 }
 0x1e0   : > { %v5456_v1 = vpop.f32.mrb[14].mxu1 }
 0x1e1   : > { %v5458_v40 = vpop.f32.mrb[15].mxu1 }
 0x1e6   : > { %v4127_v19 = vpop.f32.mrb[0].mxu0 }
 0x1e7   : > { %v4159_v16 = vadd.f32 %v4127_v19, %v3957_v30  ;;  %v2772_v52 = vpop.f32.mrb[1].mxu0 }
 0x1e8   : > { %v4160_v3 = vadd.f32 %v2772_v52, %v1686_v57  ;;  %v4128_v4 = vpop.f32.mrb[2].mxu0 }
 0x1e9   : > { %v4161_v11 = vadd.f32 %v4128_v4, %v3958_v62  ;;  %v2775_v21 = vpop.f32.mrb[3].mxu0  ;;  %v3131_v39 = vmul.f32 %v4159_v16, %v4159_v16 }
 0x1ea   : > { %v4162_v13 = vadd.f32 %v2775_v21, %v1689_v5  ;;  %v3129_v9 = vmul.f32 %v4160_v3, %v4160_v3 }
 0x1eb   : > { %v3611_v24 = vpack.c.bf16 %v4161_v11, %v4159_v16  ;;  %v3132_v7 = vmul.f32 %v4161_v11, %v4161_v11 }
 0x1ec   : > { %v3606_v10 = vpack.c.bf16 %v4162_v13, %v4160_v3  ;;  %v3091_v51 = vadd.f32 %v4162_v13, %v4160_v3  ;;  %v3130_v33 = vmul.f32 %v4162_v13, %v4162_v13 }
 0x1ed   : > { %3683 = vst [vmem:[%s5464_s20 + $0x8] sm:$0xff] %v3611_v24  }
 0x1ee   : > { %3607 = vst [vmem:[%s5464_s20] sm:$0xff] %v3606_v10   ;;  %v3092_v58 = vadd.f32 %v4159_v16, %v3091_v51  ;;  %v3161_v42 = vadd.f32 %v3130_v33, %v3129_v9  ;;  %v4131_v15 = vpop.f32.mrb[4].mxu0 }
 0x1ef   : > { %v4163_v27 = vadd.f32 %v4131_v15, %v3961_v63  ;;  %v2788_v6 = vpop.f32.mrb[5].mxu0 }
 0x1f0   : > { %v3162_v60 = vadd.f32 %v3161_v42, %v3131_v39  ;;  %v4164_v14 = vadd.f32 %v2788_v6, %v1702_v49  ;;  %v3093_v28 = vadd.f32 %v4161_v11, %v3092_v58  ;;  %v4132_v25 = vpop.f32.mrb[6].mxu0 }
 0x1f1   : > { %v4165_v38 = vadd.f32 %v4132_v25, %v3962_v54  ;;  %v2791_v46 = vpop.f32.mrb[7].mxu0  ;;  %v3135_v48 = vmul.f32 %v4163_v27, %v4163_v27 }
 0x1f2   : > { %v3094_v47 = vadd.f32 %v4164_v14, %v3093_v28  ;;  %v3133_v32 = vmul.f32 %v4164_v14, %v4164_v14  ;;  %v3163_v18 = vadd.f32 %v3162_v60, %v3132_v7  ;;  %v4166_v43 = vadd.f32 %v2791_v46, %v1705_v36 }
 0x1f3   : > { %v3621_v55 = vpack.c.bf16 %v4165_v38, %v4163_v27  ;;  %v3136_v34 = vmul.f32 %v4165_v38, %v4165_v38 }
 0x1f4   : > { %v3164_v12 = vadd.f32 %v3163_v18, %v3133_v32  ;;  %v3616_v23 = vpack.c.bf16 %v4166_v43, %v4164_v14  ;;  %v3095_v59 = vadd.f32 %v4166_v43, %v3094_v47  ;;  %v3134_v35 = vmul.f32 %v4166_v43, %v4166_v43 }
 0x1f5   : > { %3685 = vst [vmem:[%s5464_s20 + $0x18] sm:$0xff] %v3621_v55  }
 0x1f6   : > { %3684 = vst [vmem:[%s5464_s20 + $0x10] sm:$0xff] %v3616_v23   ;;  %v3096_v2 = vadd.f32 %v4163_v27, %v3095_v59  ;;  %v3165_v61 = vadd.f32 %v3164_v12, %v3134_v35  ;;  %v4135_v56 = vpop.f32.mrb[8].mxu0 }
 0x1f7   : > { %v4167_v53 = vadd.f32 %v4135_v56, %v3965_v45  ;;  %v2804_v17 = vpop.f32.mrb[9].mxu0 }
 0x1f8   : > { %v3166_v37 = vadd.f32 %v3165_v61, %v3135_v48  ;;  %v4168_v41 = vadd.f32 %v2804_v17, %v1718_v31  ;;  %v3097_v50 = vadd.f32 %v4165_v38, %v3096_v2  ;;  %v4136_v20 = vpop.f32.mrb[10].mxu0 }
 0x1f9   : > { %v4169_v0 = vadd.f32 %v4136_v20, %v3966_v29  ;;  %v2807_v22 = vpop.f32.mrb[11].mxu0  ;;  %v3139_v45 = vmul.f32 %v4167_v53, %v4167_v53 }
 0x1fa   : > { %v3098_v30 = vadd.f32 %v4168_v41, %v3097_v50  ;;  %v3137_v57 = vmul.f32 %v4168_v41, %v4168_v41  ;;  %v3167_v62 = vadd.f32 %v3166_v37, %v3136_v34  ;;  %v4170_v5 = vadd.f32 %v2807_v22, %v1721_v26 }
 0x1fb   : > { %v3631_v63 = vpack.c.bf16 %v4169_v0, %v4167_v53  ;;  %v3140_v29 = vmul.f32 %v4169_v0, %v4169_v0 }
 0x1fc   : > { %v3168_v49 = vadd.f32 %v3167_v62, %v3137_v57  ;;  %v3626_v54 = vpack.c.bf16 %v4170_v5, %v4168_v41  ;;  %v3099_v36 = vadd.f32 %v4170_v5, %v3098_v30  ;;  %v3138_v19 = vmul.f32 %v4170_v5, %v4170_v5 }
 0x1fd   : > { %3687 = vst [vmem:[%s5464_s20 + $0x28] sm:$0xff] %v3631_v63  }
 0x1fe   : > { %3686 = vst [vmem:[%s5464_s20 + $0x20] sm:$0xff] %v3626_v54   ;;  %v3100_v16 = vadd.f32 %v4167_v53, %v3099_v36  ;;  %v3169_v52 = vadd.f32 %v3168_v49, %v3138_v19  ;;  %v4139_v31 = vpop.f32.mrb[12].mxu0 }
 0x1ff   : > { %v4171_v3 = vadd.f32 %v4139_v31, %v5452_v44  ;;  %v2820_v4 = vpop.f32.mrb[13].mxu0 }
 0x200   : > { %v3170_v11 = vadd.f32 %v3169_v52, %v3139_v45  ;;  %v4172_v21 = vadd.f32 %v2820_v4, %v5454_v8  ;;  %v3101_v26 = vadd.f32 %v4169_v0, %v3100_v16  ;;  %v4140_v13 = vpop.f32.mrb[14].mxu0 }
 0x201   : > { %v4173_v24 = vadd.f32 %v4140_v13, %v5456_v1  ;;  %v2823_v9 = vpop.f32.mrb[15].mxu0  ;;  %v3143_v6 = vmul.f32 %v4171_v3, %v4171_v3 }
 0x202   : > { %v3102_v10 = vadd.f32 %v4172_v21, %v3101_v26  ;;  %v3141_v51 = vmul.f32 %v4172_v21, %v4172_v21  ;;  %v3171_v33 = vadd.f32 %v3170_v11, %v3140_v29  ;;  %v4174_v39 = vadd.f32 %v2823_v9, %v5458_v40 }
 0x203   : > { %v3641_v58 = vpack.c.bf16 %v4173_v24, %v4171_v3  ;;  %v3144_v38 = vmul.f32 %v4173_v24, %v4173_v24 }
 0x204   : > { %v3172_v42 = vadd.f32 %v3171_v33, %v3141_v51  ;;  %v3636_v44 = vpack.c.bf16 %v4174_v39, %v4172_v21  ;;  %v3103_v15 = vadd.f32 %v4174_v39, %v3102_v10  ;;  %v3142_v27 = vmul.f32 %v4174_v39, %v4174_v39 }
 0x205   : > { %3689 = vst [vmem:[%s5464_s20 + $0x38] sm:$0xff] %v3641_v58  }
 0x206   : > { %3688 = vst [vmem:[%s5464_s20 + $0x30] sm:$0xff] %v3636_v44   ;;  %v3104_v8 = vadd.f32 %v4171_v3, %v3103_v15  ;;  %v3173_v7 = vadd.f32 %v3172_v42, %v3142_v27  ;;  %v4007_v60 = vpop.f32.mrb[16].mxu1  ;;  %v4143_v14 = vpop.f32.mrb[16].mxu0 }
 0x207   : > { %v4175_v28 = vadd.f32 %v4143_v14, %v4007_v60  ;;  %v1978_v1 = vpop.f32.mrb[17].mxu1  ;;  %v2836_v25 = vpop.f32.mrb[17].mxu0 }
 0x208   : > { %v3174_v46 = vadd.f32 %v3173_v7, %v3143_v6  ;;  %v4176_v47 = vadd.f32 %v2836_v25, %v1978_v1  ;;  %v3105_v40 = vadd.f32 %v4173_v24, %v3104_v8  ;;  %v4008_v32 = vpop.f32.mrb[18].mxu1  ;;  %v4144_v18 = vpop.f32.mrb[18].mxu0 }
 0x209   : > { %v4177_v43 = vadd.f32 %v4144_v18, %v4008_v32  ;;  %v1981_v55 = vpop.f32.mrb[19].mxu1  ;;  %v2839_v12 = vpop.f32.mrb[19].mxu0  ;;  %v3147_v34 = vmul.f32 %v4175_v28, %v4175_v28 }
 0x20a   : > { %v3106_v23 = vadd.f32 %v4176_v47, %v3105_v40  ;;  %v3145_v59 = vmul.f32 %v4176_v47, %v4176_v47  ;;  %v3175_v35 = vadd.f32 %v3174_v46, %v3144_v38  ;;  %v4178_v48 = vadd.f32 %v2839_v12, %v1981_v55 }
 0x20b   : > { %v3651_v2 = vpack.c.bf16 %v4177_v43, %v4175_v28  ;;  %v3148_v57 = vmul.f32 %v4177_v43, %v4177_v43 }
 0x20c   : > { %v3176_v61 = vadd.f32 %v3175_v35, %v3145_v59  ;;  %v3646_v56 = vpack.c.bf16 %v4178_v48, %v4176_v47  ;;  %v3107_v53 = vadd.f32 %v4178_v48, %v3106_v23  ;;  %v3146_v17 = vmul.f32 %v4178_v48, %v4178_v48 }
 0x20d   : > { %3691 = vst [vmem:[%s5464_s20 + $0x48] sm:$0xff] %v3651_v2  }
 0x20e   : > { %3690 = vst [vmem:[%s5464_s20 + $0x40] sm:$0xff] %v3646_v56   ;;  %v3108_v37 = vadd.f32 %v4175_v28, %v3107_v53  ;;  %v3177_v41 = vadd.f32 %v3176_v61, %v3146_v17  ;;  %v4011_v50 = vpop.f32.mrb[20].mxu1  ;;  %v4147_v20 = vpop.f32.mrb[20].mxu0 }
 0x20f   : > { %v4179_v0 = vadd.f32 %v4147_v20, %v4011_v50  ;;  %v1994_v22 = vpop.f32.mrb[21].mxu1  ;;  %v2852_v30 = vpop.f32.mrb[21].mxu0 }
 0x210   : > { %v3178_v62 = vadd.f32 %v3177_v41, %v3147_v34  ;;  %v4180_v5 = vadd.f32 %v2852_v30, %v1994_v22  ;;  %v3109_v63 = vadd.f32 %v4177_v43, %v3108_v37  ;;  %v4012_v49 = vpop.f32.mrb[22].mxu1  ;;  %v4148_v54 = vpop.f32.mrb[22].mxu0 }
 0x211   : > { %v4181_v36 = vadd.f32 %v4148_v54, %v4012_v49  ;;  %v1997_v19 = vpop.f32.mrb[23].mxu1  ;;  %v2855_v45 = vpop.f32.mrb[23].mxu0  ;;  %v3151_v13 = vmul.f32 %v4179_v0, %v4179_v0 }
 0x212   : > { %v3110_v16 = vadd.f32 %v4180_v5, %v3109_v63  ;;  %v3149_v52 = vmul.f32 %v4180_v5, %v4180_v5  ;;  %v3179_v31 = vadd.f32 %v3178_v62, %v3148_v57  ;;  %v4182_v3 = vadd.f32 %v2855_v45, %v1997_v19 }
 0x213   : > { %v3661_v4 = vpack.c.bf16 %v4181_v36, %v4179_v0  ;;  %v3152_v42 = vmul.f32 %v4181_v36, %v4181_v36 }
 0x214   : > { %v3180_v29 = vadd.f32 %v3179_v31, %v3149_v52  ;;  %v3656_v11 = vpack.c.bf16 %v4182_v3, %v4180_v5  ;;  %v3111_v21 = vadd.f32 %v4182_v3, %v3110_v16  ;;  %v3150_v26 = vmul.f32 %v4182_v3, %v4182_v3 }
 0x215   : > { %3693 = vst [vmem:[%s5464_s20 + $0x58] sm:$0xff] %v3661_v4  }
 0x216   : > { %3692 = vst [vmem:[%s5464_s20 + $0x50] sm:$0xff] %v3656_v11   ;;  %v3112_v24 = vadd.f32 %v4179_v0, %v3111_v21  ;;  %v3181_v9 = vadd.f32 %v3180_v29, %v3150_v26  ;;  %v4015_v10 = vpop.f32.mrb[24].mxu1  ;;  %v4151_v51 = vpop.f32.mrb[24].mxu0 }
 0x217   : > { %v4183_v33 = vadd.f32 %v4151_v51, %v4015_v10  ;;  %v2010_v39 = vpop.f32.mrb[25].mxu1  ;;  %v2868_v58 = vpop.f32.mrb[25].mxu0 }
 0x218   : > { %v3182_v44 = vadd.f32 %v3181_v9, %v3151_v13  ;;  %v4184_v15 = vadd.f32 %v2868_v58, %v2010_v39  ;;  %v3113_v27 = vadd.f32 %v4181_v36, %v3112_v24  ;;  %v4016_v6 = vpop.f32.mrb[26].mxu1  ;;  %v4152_v8 = vpop.f32.mrb[26].mxu0 }
 0x219   : > { %v4185_v7 = vadd.f32 %v4152_v8, %v4016_v6  ;;  %v2013_v60 = vpop.f32.mrb[27].mxu1  ;;  %v2871_v14 = vpop.f32.mrb[27].mxu0  ;;  %v3155_v43 = vmul.f32 %v4183_v33, %v4183_v33 }
 0x21a   : > { %v3114_v28 = vadd.f32 %v4184_v15, %v3113_v27  ;;  %v3153_v1 = vmul.f32 %v4184_v15, %v4184_v15  ;;  %v3183_v25 = vadd.f32 %v3182_v44, %v3152_v42  ;;  %v4186_v38 = vadd.f32 %v2871_v14, %v2013_v60 }
 0x21b   : > { %v3671_v46 = vpack.c.bf16 %v4185_v7, %v4183_v33  ;;  %v3156_v61 = vmul.f32 %v4185_v7, %v4185_v7 }
 0x21c   : > { %v3184_v47 = vadd.f32 %v3183_v25, %v3153_v1  ;;  %v3666_v40 = vpack.c.bf16 %v4186_v38, %v4184_v15  ;;  %v3115_v32 = vadd.f32 %v4186_v38, %v3114_v28  ;;  %v3154_v18 = vmul.f32 %v4186_v38, %v4186_v38 }
 0x21d   : > { %3695 = vst [vmem:[%s5464_s20 + $0x68] sm:$0xff] %v3671_v46  }
 0x21e   : > { %3694 = vst [vmem:[%s5464_s20 + $0x60] sm:$0xff] %v3666_v40   ;;  %v3116_v55 = vadd.f32 %v4183_v33, %v3115_v32  ;;  %v3185_v12 = vadd.f32 %v3184_v47, %v3154_v18  ;;  %v4019_v23 = vpop.f32.mrb[28].mxu1  ;;  %v4155_v59 = vpop.f32.mrb[28].mxu0 }
 0x21f   : > { %v4187_v35 = vadd.f32 %v4155_v59, %v4019_v23  ;;  %v2026_v48 = vpop.f32.mrb[29].mxu1  ;;  %v2884_v2 = vpop.f32.mrb[29].mxu0 }
 0x220   : > { %v3186_v56 = vadd.f32 %v3185_v12, %v3155_v43  ;;  %v4188_v53 = vadd.f32 %v2884_v2, %v2026_v48  ;;  %v3117_v17 = vadd.f32 %v4185_v7, %v3116_v55  ;;  %v4020_v34 = vpop.f32.mrb[30].mxu1  ;;  %v4156_v37 = vpop.f32.mrb[30].mxu0 }
 0x221   : > { %v4189_v41 = vadd.f32 %v4156_v37, %v4020_v34  ;;  %v2029_v50 = vpop.f32.mrb[31].mxu1  ;;  %v2887_v20 = vpop.f32.mrb[31].mxu0  ;;  %v3159_v36 = vmul.f32 %v4187_v35, %v4187_v35 }
 0x222   : > { %v3118_v0 = vadd.f32 %v4188_v53, %v3117_v17  ;;  %v3157_v22 = vmul.f32 %v4188_v53, %v4188_v53  ;;  %v3187_v30 = vadd.f32 %v3186_v56, %v3156_v61  ;;  %v4190_v57 = vadd.f32 %v2887_v20, %v2029_v50 }
 0x223   : > { %v3681_v62 = vpack.c.bf16 %v4189_v41, %v4187_v35  ;;  %v3160_v16 = vmul.f32 %v4189_v41, %v4189_v41 }
 0x224   : > { %v3188_v5 = vadd.f32 %v3187_v30, %v3157_v22  ;;  %v3676_v63 = vpack.c.bf16 %v4190_v57, %v4188_v53  ;;  %v3119_v49 = vadd.f32 %v4190_v57, %v3118_v0  ;;  %v3158_v54 = vmul.f32 %v4190_v57, %v4190_v57 }
 0x225   : > { %3697 = vst [vmem:[%s5464_s20 + $0x78] sm:$0xff] %v3681_v62  }
 0x226   : > { %3696 = vst [vmem:[%s5464_s20 + $0x70] sm:$0xff] %v3676_v63   ;;  %v3120_v19 = vadd.f32 %v4187_v35, %v3119_v49  ;;  %v3189_v45 = vadd.f32 %v3188_v5, %v3158_v54 }
 0x228   : > { %v3121_v52 = vadd.f32 %v4189_v41, %v3120_v19  ;;  %v3190_v31 = vadd.f32 %v3189_v45, %v3159_v36 }
 0x22a   : > { %v3122_v3 = vrot.slane %v3121_v52, 4  ;;  %v3191_v4 = vadd.f32 %v3190_v31, %v3160_v16 }
 0x22c   : > { %v3123_v29 = vadd.f32 %v3122_v3, %v3121_v52  ;;  %v3192_v11 = vrot.slane %v3191_v4, 4 }
 0x22e   : > { %v3124_v21 = vrot.slane %v3123_v29, 2  ;;  %v3193_v26 = vadd.f32 %v3192_v11, %v3191_v4 }
 0x230   : > { %v3125_v13 = vadd.f32 %v3124_v21, %v3123_v29  ;;  %v3194_v24 = vrot.slane %v3193_v26, 2 }
 0x232   : > { %v3126_v9 = vrot.slane %v3125_v13, 1  ;;  %v3195_v10 = vadd.f32 %v3194_v24, %v3193_v26 }
 0x234   : > { %v3127_v51 = vadd.f32 %v3126_v9, %v3125_v13  ;;  %v3196_v33 = vrot.slane %v3195_v10, 1 }
 0x236   : > { %3128 = vst [vmem:[%s211_s23] sm:$0x1] %v3127_v51  ;;  %v3197_v39 = vadd.f32 %v3196_v33, %v3195_v10 }
 0x238   : > { %3198 = vst [vmem:[%s214_s26] sm:$0x1] %v3197_v39 }
 0x239 PF: > { %s15_s15 = sadd.s32 1, %s4462_s15  }
 0x23a   : > { %p12_p4 = scmp.ge.s32.totalorder %s15_s15, 4  }
 0x23c   :  { %14 = sbr.rel (!%p12_p4) target bundleno = 1 (0x1), region = 90 }

</bundles_post_ra>
